<compile_context>
chip_gen: v7x
topology: tpu7x:2x2x1
jax: 0.10.0
libtpu: 0.0.40
codegen_flags: <defaults>
</compile_context>

<pallas_src>
import functools

import jax
import jax.numpy as jnp
from jax.experimental import pallas as pl
from jax.experimental.pallas import tpu as pltpu

EPS = 1e-5          # PyTorch BatchNorm1d default eps
K = 7               # kernel_size of both conv blocks
S = 2               # stride of both conv blocks
C1 = 8              # out channels of block1
C2 = 16             # out channels of block2


def _conv_out_len(t, k, s):
    return (t - k) // s + 1


# ----------------------------- Pallas kernel ------------------------------ #
def _tcn_kernel(x_ref, w1_ref, b1_ref, w2_ref, b2_ref, fcw_ref, fcb_ref, o_ref):
    """One block of `block_b` batch lanes: full tcn_Networks forward.

    Three MXU matmuls, no scratch, no slicing:
      block1: (T1*C1, T)      @ (T, bl)      + shift, ReLU
      block2: (T2*C2, T1*C1)  @ (T1*C1, bl)  + shift, ReLU
      fc    : (out, T2*C2)    @ (T2*C2, bl)  + bias
    """
    h1 = jnp.dot(w1_ref[...], x_ref[...], preferred_element_type=jnp.float32)
    h1 = jnp.maximum(h1 + b1_ref[...], 0.0)

    h2 = jnp.dot(w2_ref[...], h1, preferred_element_type=jnp.float32)
    h2 = jnp.maximum(h2 + b2_ref[...], 0.0)

    # TODO(synk): Dropout(p=0.2) is a no-op at inference; training-mode
    # stochastic masking is not implemented.

    out = jnp.dot(fcw_ref[...], h2, preferred_element_type=jnp.float32)
    o_ref[...] = (out + fcb_ref[...]).astype(o_ref.dtype)


# ----------------------- Toeplitz / banded weight build -------------------- #
def _toeplitz1(w1s, T, T1):
    """W[t1*C1 + c1, S*t1 + k] = w1s[c1, k]  (BN scale already folded)."""
    t1 = jnp.arange(T1)[:, None, None]
    c1 = jnp.arange(C1)[None, :, None]
    k = jnp.arange(K)[None, None, :]
    shape = (T1, C1, K)
    rows = jnp.broadcast_to(t1 * C1 + c1, shape).ravel()
    cols = jnp.broadcast_to(S * t1 + k, shape).ravel()
    vals = jnp.broadcast_to(w1s[None, :, :], shape).ravel()
    return jnp.zeros((T1 * C1, T), jnp.float32).at[rows, cols].set(vals)


def _toeplitz2(w2s, T1, T2):
    """W[t2*C2 + c2, (S*t2 + k)*C1 + c1] = w2s[c2, c1, k]."""
    t2 = jnp.arange(T2)[:, None, None, None]
    c2 = jnp.arange(C2)[None, :, None, None]
    c1 = jnp.arange(C1)[None, None, :, None]
    k = jnp.arange(K)[None, None, None, :]
    shape = (T2, C2, C1, K)
    rows = jnp.broadcast_to(t2 * C2 + c2, shape).ravel()
    cols = jnp.broadcast_to((S * t2 + k) * C1 + c1, shape).ravel()
    vals = jnp.broadcast_to(w2s[None, :, :, :], shape).ravel()
    return jnp.zeros((T2 * C2, T1 * C1), jnp.float32).at[rows, cols].set(vals)


def _auto_block_b(B):
    """Lane-block width: >=128 lanes, lane-dense, aiming at >=2 equal grid
    blocks once B allows it (v7x megacore), capped at 2048 lanes/block."""
    if B <= 256:
        return max(128, pl.cdiv(B, 128) * 128)
    half = pl.cdiv(B, 2)
    return min(2048, pl.cdiv(half, 128) * 128)


# ----------------------------- forward wrapper ----------------------------- #
def tcn_networks_forward(x, p, *, block_b=None):
    """Pallas-backed equivalent of tcn_Networks.forward (eval mode)."""
    N, V, T = x.shape
    B = N * V
    T1 = _conv_out_len(T, K, S)
    T2 = _conv_out_len(T1, K, S)
    hidden = C2 * T2
    out_dim = p["fc_w"].shape[0]
    assert T1 >= K and T2 >= 1, "sequence too short for two stride-2 convs"
    assert p["fc_w"].shape[1] == hidden, (p["fc_w"].shape, hidden)

    # ---- fold BatchNorm (eval mode, running stats) into weights / shifts ---
    s1 = p["g1"] / jnp.sqrt(p["v1"] + EPS)                          # (C1,)
    w1s = p["w1"].reshape(C1, K) * s1[:, None]                      # (C1, K)
    sh1 = (p["b1"] - p["m1"]) * s1 + p["be1"]                       # (C1,)

    s2 = p["g2"] / jnp.sqrt(p["v2"] + EPS)                          # (C2,)
    w2s = p["w2"] * s2[:, None, None]                               # (C2, C1, K)
    sh2 = (p["b2"] - p["m2"]) * s2 + p["be2"]                       # (C2,)

    # ---- banded (Toeplitz) conv weights, one matmul per conv block ---------
    w1t = _toeplitz1(w1s, T, T1)                                    # (T1*C1, T)
    w2t = _toeplitz2(w2s, T1, T2)                                   # (T2*C2, T1*C1)
    b1t = jnp.tile(sh1, T1)[:, None]                                # (T1*C1, 1), row = t1*C1+c1
    b2t = jnp.tile(sh2, T2)[:, None]                                # (T2*C2, 1), row = t2*C2+c2

    # bake PyTorch's channel-major flatten (col = c2*T2 + t2) into fc weights
    # so the kernel's natural (t2, c2) row ordering needs no transpose.
    fcw = p["fc_w"].reshape(out_dim, C2, T2).transpose(0, 2, 1).reshape(out_dim, hidden)
    fcb = p["fc_b"][:, None]                                        # (out_dim, 1)

    # ---- batch on the lane axis, padded to a multiple of block_b -----------
    if block_b is None:
        block_b = _auto_block_b(B)
    xt = x.reshape(B, T).T                                          # (T, B)
    n_blk = pl.cdiv(B, block_b)
    Bp = n_blk * block_b
    if Bp != B:
        xt = jnp.pad(xt, ((0, 0), (0, Bp - B)))

    flops_per_col = 2 * (T1 * C1 * T + T2 * C2 * T1 * C1 + out_dim * hidden)
    cost = pl.CostEstimate(
        flops=int(flops_per_col * Bp),
        transcendentals=0,
        bytes_accessed=int(4 * (T * Bp + out_dim * Bp
                                + w1t.size + w2t.size + fcw.size
                                + b1t.size + b2t.size + fcb.size)),
    )

    out_t = pl.pallas_call(
        _tcn_kernel,
        out_shape=jax.ShapeDtypeStruct((out_dim, Bp), jnp.float32),
        grid=(n_blk,),
        in_specs=[
            pl.BlockSpec((T, block_b), lambda i: (0, i)),           # x (lane-blocked)
            pl.BlockSpec((T1 * C1, T), lambda i: (0, 0)),           # W1 Toeplitz
            pl.BlockSpec((T1 * C1, 1), lambda i: (0, 0)),           # shift1 per row
            pl.BlockSpec((T2 * C2, T1 * C1), lambda i: (0, 0)),     # W2 Toeplitz
            pl.BlockSpec((T2 * C2, 1), lambda i: (0, 0)),           # shift2 per row
            pl.BlockSpec((out_dim, hidden), lambda i: (0, 0)),      # fc_w (permuted)
            pl.BlockSpec((out_dim, 1), lambda i: (0, 0)),           # fc_b
        ],
        out_specs=pl.BlockSpec((out_dim, block_b), lambda i: (0, i)),
        compiler_params=pltpu.CompilerParams(
            dimension_semantics=("parallel",)),
        cost_estimate=cost,
    )(xt, w1t, b1t, w2t, b2t, fcw, fcb)

    return out_t[:, :B].T.reshape(N, V, out_dim)


# ------------------------ pure-JAX reference (check) ----------------------- #
def reference_forward(x, p):
    N, V, T = x.shape
    xb = x.reshape(N * V, 1, T)

    def block(h, w, b, g, be, m, v):
        y = jax.lax.conv_general_dilated(
            h, w, window_strides=(S,), padding="VALID",
            dimension_numbers=("NCH", "OIH", "NCH"))
        y = y + b[None, :, None]
        y = (y - m[None, :, None]) / jnp.sqrt(v[None, :, None] + EPS)
        y = g[None, :, None] * y + be[None, :, None]
        return jnp.maximum(y, 0.0)

    h1 = block(xb, p["w1"], p["b1"], p["g1"], p["be1"], p["m1"], p["v1"])
    h2 = block(h1, p["w2"], p["b2"], p["g2"], p["be2"], p["m2"], p["v2"])
    feat = h2.reshape(N, V, -1)
    return feat @ p["fc_w"].T + p["fc_b"]


# ------------------------------ params init -------------------------------- #
def init_params(key, hidden_dim, out_dim):
    ks = jax.random.split(key, 14)

    def n(i, shape, scale=0.1):
        return scale * jax.random.normal(ks[i], shape, jnp.float32)

    return dict(
        # block1: Conv1d(1, 8, 7, stride=2) + BatchNorm1d(8)
        w1=n(0, (C1, 1, K), 0.3), b1=n(1, (C1,)),
        g1=1.0 + n(2, (C1,)), be1=n(3, (C1,)), m1=n(4, (C1,)),
        v1=0.5 + jnp.abs(n(5, (C1,), 1.0)),
        # block2: Conv1d(8, 16, 7, stride=2) + BatchNorm1d(16)
        w2=n(6, (C2, C1, K), 0.2), b2=n(7, (C2,)),
        g2=1.0 + n(8, (C2,)), be2=n(9, (C2,)), m2=n(10, (C2,)),
        v2=0.5 + jnp.abs(n(11, (C2,), 1.0)),
        # fc: Linear(hidden_dim, out_dim)
        fc_w=n(12, (out_dim, hidden_dim), 0.1), fc_b=n(13, (out_dim,)),
    )


if __name__ == "__main__":
    # B = N*V = 480 -> auto block_b = 256, grid of 2 "parallel" blocks
    # (exercises the batch grid, lane padding, and the v7x even-grid rule).
    N, V, T = 8, 60, 64
    T1 = _conv_out_len(T, K, S)        # 29
    T2 = _conv_out_len(T1, K, S)       # 12
    hidden_dim = C2 * T2               # 192 (what the forward implies)
    out_dim = 32

    key = jax.random.PRNGKey(0)
    kx, kp = jax.random.split(key)
    x = jax.random.normal(kx, (N, V, T), jnp.float32)
    params = init_params(kp, hidden_dim, out_dim)

    fwd = jax.jit(tcn_networks_forward)
    out = jax.block_until_ready(fwd(x, params))

    ref = reference_forward(x, params)
    assert out.shape == (N, V, out_dim), out.shape
    max_err = float(jnp.max(jnp.abs(out - ref)))
    assert jnp.allclose(out, ref, atol=1e-3, rtol=1e-3), max_err

    print("KERNEL_OK")
</pallas_src>

<mosaic_0001>
module attributes {stable_mosaic.version = 11 : i64} {
  func.func @_tcn_kernel(%arg0: i32, %arg1: memref<64x256xf32, #tpu.memory_space<vmem>>, %arg2: memref<232x64xf32, #tpu.memory_space<vmem>>, %arg3: memref<232x1xf32, #tpu.memory_space<vmem>>, %arg4: memref<192x232xf32, #tpu.memory_space<vmem>>, %arg5: memref<192x1xf32, #tpu.memory_space<vmem>>, %arg6: memref<32x192xf32, #tpu.memory_space<vmem>>, %arg7: memref<32x1xf32, #tpu.memory_space<vmem>>, %arg8: memref<32x256xf32, #tpu.memory_space<vmem>>) attributes {dimension_semantics = [#tpu.dimension_semantics<parallel>], iteration_bounds = array<i64: 2>, scalar_prefetch = 0 : i64, scratch_operands = 0 : i64, tpu.core_type = #tpu.core_type<tc>, window_params = [{transform_indices = @transform_0, window_bounds = array<i64: 64, 256>}, {pipeline_mode = #tpu.pipeline_mode<synchronous>, transform_indices = @transform_1, window_bounds = array<i64: 232, 64>}, {pipeline_mode = #tpu.pipeline_mode<synchronous>, transform_indices = @transform_2, window_bounds = array<i64: 232, 1>}, {pipeline_mode = #tpu.pipeline_mode<synchronous>, transform_indices = @transform_3, window_bounds = array<i64: 192, 232>}, {pipeline_mode = #tpu.pipeline_mode<synchronous>, transform_indices = @transform_4, window_bounds = array<i64: 192, 1>}, {pipeline_mode = #tpu.pipeline_mode<synchronous>, transform_indices = @transform_5, window_bounds = array<i64: 32, 192>}, {pipeline_mode = #tpu.pipeline_mode<synchronous>, transform_indices = @transform_6, window_bounds = array<i64: 32, 1>}, {transform_indices = @transform_7, window_bounds = array<i64: 32, 256>}]} {
    %c0 = arith.constant 0 : index
    %c0_0 = arith.constant 0 : index
    %0 = vector.load %arg2[%c0, %c0_0] : memref<232x64xf32, #tpu.memory_space<vmem>>, vector<232x64xf32>
    %c0_1 = arith.constant 0 : index
    %c0_2 = arith.constant 0 : index
    %1 = vector.load %arg1[%c0_1, %c0_2] : memref<64x256xf32, #tpu.memory_space<vmem>>, vector<64x256xf32>
    %cst = arith.constant dense<0.000000e+00> : vector<232x256xf32>
    %2 = tpu.matmul %0, %1, %cst {dimension_numbers = #tpu.dot_dimension_numbers<[1], [0], [0], [1], [0, 0, 1, 1], [], []>} : vector<232x64xf32>, vector<64x256xf32>, vector<232x256xf32> -> vector<232x256xf32>
    %c0_3 = arith.constant 0 : index
    %c0_4 = arith.constant 0 : index
    %3 = vector.load %arg3[%c0_3, %c0_4] : memref<232x1xf32, #tpu.memory_space<vmem>>, vector<232x1xf32>
    %4 = vector.broadcast %3 : vector<232x1xf32> to vector<232x256xf32>
    %5 = arith.addf %2, %4 : vector<232x256xf32>
    %cst_5 = arith.constant 0.000000e+00 : f32
    %6 = vector.broadcast %cst_5 : f32 to vector<232x256xf32>
    %7 = arith.maximumf %5, %6 : vector<232x256xf32>
    %c0_6 = arith.constant 0 : index
    %c0_7 = arith.constant 0 : index
    %8 = vector.load %arg4[%c0_6, %c0_7] : memref<192x232xf32, #tpu.memory_space<vmem>>, vector<192x232xf32>
    %cst_8 = arith.constant dense<0.000000e+00> : vector<192x256xf32>
    %9 = tpu.matmul %8, %7, %cst_8 {dimension_numbers = #tpu.dot_dimension_numbers<[1], [0], [0], [1], [0, 0, 1, 1], [], []>} : vector<192x232xf32>, vector<232x256xf32>, vector<192x256xf32> -> vector<192x256xf32>
    %c0_9 = arith.constant 0 : index
    %c0_10 = arith.constant 0 : index
    %10 = vector.load %arg5[%c0_9, %c0_10] : memref<192x1xf32, #tpu.memory_space<vmem>>, vector<192x1xf32>
    %11 = vector.broadcast %10 : vector<192x1xf32> to vector<192x256xf32>
    %12 = arith.addf %9, %11 : vector<192x256xf32>
    %cst_11 = arith.constant 0.000000e+00 : f32
    %13 = vector.broadcast %cst_11 : f32 to vector<192x256xf32>
    %14 = arith.maximumf %12, %13 : vector<192x256xf32>
    %c0_12 = arith.constant 0 : index
    %c0_13 = arith.constant 0 : index
    %15 = vector.load %arg6[%c0_12, %c0_13] : memref<32x192xf32, #tpu.memory_space<vmem>>, vector<32x192xf32>
    %cst_14 = arith.constant dense<0.000000e+00> : vector<32x256xf32>
    %16 = tpu.matmul %15, %14, %cst_14 {dimension_numbers = #tpu.dot_dimension_numbers<[1], [0], [0], [1], [0, 0, 1, 1], [], []>} : vector<32x192xf32>, vector<192x256xf32>, vector<32x256xf32> -> vector<32x256xf32>
    %c0_15 = arith.constant 0 : index
    %c0_16 = arith.constant 0 : index
    %17 = vector.load %arg7[%c0_15, %c0_16] : memref<32x1xf32, #tpu.memory_space<vmem>>, vector<32x1xf32>
    %18 = vector.broadcast %17 : vector<32x1xf32> to vector<32x256xf32>
    %19 = arith.addf %16, %18 : vector<32x256xf32>
    %c0_17 = arith.constant 0 : index
    %c0_18 = arith.constant 0 : index
    %20 = vector.load %arg8[%c0_17, %c0_18] : memref<32x256xf32, #tpu.memory_space<vmem>>, vector<32x256xf32>
    tpu.vector_store %arg8[%c0_17, %c0_18], %19 {strides = array<i32>} : memref<32x256xf32, #tpu.memory_space<vmem>>, vector<32x256xf32>,
    return
  }
  func.func @transform_0(%arg0: i32) -> (i32, i32) {
    %c0_i32 = arith.constant 0 : i32
    %c0_i32_0 = arith.constant 0 : i32
    return %c0_i32, %arg0 : i32, i32
  }
  func.func @transform_1(%arg0: i32) -> (i32, i32) {
    %c0_i32 = arith.constant 0 : i32
    %c0_i32_0 = arith.constant 0 : i32
    %c0_i32_1 = arith.constant 0 : i32
    return %c0_i32, %c0_i32_0 : i32, i32
  }
  func.func @transform_2(%arg0: i32) -> (i32, i32) {
    %c0_i32 = arith.constant 0 : i32
    %c0_i32_0 = arith.constant 0 : i32
    %c0_i32_1 = arith.constant 0 : i32
    return %c0_i32, %c0_i32_0 : i32, i32
  }
  func.func @transform_3(%arg0: i32) -> (i32, i32) {
    %c0_i32 = arith.constant 0 : i32
    %c0_i32_0 = arith.constant 0 : i32
    %c0_i32_1 = arith.constant 0 : i32
    return %c0_i32, %c0_i32_0 : i32, i32
  }
  func.func @transform_4(%arg0: i32) -> (i32, i32) {
    %c0_i32 = arith.constant 0 : i32
    %c0_i32_0 = arith.constant 0 : i32
    %c0_i32_1 = arith.constant 0 : i32
    return %c0_i32, %c0_i32_0 : i32, i32
  }
  func.func @transform_5(%arg0: i32) -> (i32, i32) {
    %c0_i32 = arith.constant 0 : i32
    %c0_i32_0 = arith.constant 0 : i32
    %c0_i32_1 = arith.constant 0 : i32
    return %c0_i32, %c0_i32_0 : i32, i32
  }
  func.func @transform_6(%arg0: i32) -> (i32, i32) {
    %c0_i32 = arith.constant 0 : i32
    %c0_i32_0 = arith.constant 0 : i32
    %c0_i32_1 = arith.constant 0 : i32
    return %c0_i32, %c0_i32_0 : i32, i32
  }
  func.func @transform_7(%arg0: i32) -> (i32, i32) {
    %c0_i32 = arith.constant 0 : i32
    %c0_i32_0 = arith.constant 0 : i32
    return %c0_i32, %arg0 : i32, i32
  }
}

</mosaic_0001>

<bundles_post_ra>
// kernel: tile.13
= control target key start
LH: loop header
LB: loop body
LE: loop exit
PB: predicated region body
PF: predicated region fallthrough
CT: control target
= control target key end

     0   :  { %s40_s0 = inlined_call_operand.vmem [shape: f32[8], index: 0, kind: input, shape index: {}]   ;;  %s41_s1 = inlined_call_operand.vmem [shape: f32[29,8], index: 1, kind: output, shape index: {}]  }
   0x1   :  { %v4_v0 = vld [vmem:[%s40_s0] ss:$0 sm:$0xff] }
   0x2   :  { %5 = vst [vmem:[%s41_s1] sm:$0xff] %v4_v0  ;;  %12 = vst [vmem:[%s41_s1 + $0x8] sm:$0xff] %v4_v0 }
   0x3   :  { %13 = vst [vmem:[%s41_s1 + $0x10] sm:$0xff] %v4_v0  ;;  %14 = vst [vmem:[%s41_s1 + $0x18] sm:$0xff] %v4_v0 }

// kernel: tile.0
= control target key start
LH: loop header
LB: loop body
LE: loop exit
PB: predicated region body
PF: predicated region fallthrough
CT: control target
= control target key end

     0   :  { %vm3_vm0 = vcmask 7168   ;;  %s365_s10 = smov 127   ;;  %s366_s27 = smov 126   ;;  %s671_s0 = inlined_call_operand.vmem [shape: f32[29,8], index: 0, kind: input, shape index: {}]   ;;  %s672_s1 = inlined_call_operand.vmem [shape: f32[232,1], index: 1, kind: output, shape index: {}]  }
   0x1   :  { %v286_v0 = vld [vmem:[%s671_s0 + $0x10] sm:$0xff]   ;;  %v27_v1 = vld [vmem:[%s671_s0] sm:$0xff]   ;;  %v283_v2 = vld [vmem:[%s671_s0 + $0x8] sm:$0xff]   ;;  %s367_s30 = smov 125   ;;  %s368_s4 = smov 124  }
   0x2   :  { %46 = vrot.lane.b32.xlu1 %v286_v0, %s365_s10  ;;  %28 = vrot.lane.b32.xlu0 %v27_v1, %s365_s10  ;;  %4 = vst.msk [vmem:[%s672_s1] ss:$8 sm:$0xf] %vm3_vm0, %v27_v1   ;;  %5 = vst.msk [vmem:[%s672_s1] ss:$8 sm:$0xf0] %vm3_vm0, %v27_v1  }
   0x3   :  { %276 = vst.msk [vmem:[%s672_s1 + $0x80] ss:$8 sm:$0xf] %vm3_vm0, %v286_v0   ;;  %277 = vst.msk [vmem:[%s672_s1 + $0x80] ss:$8 sm:$0xf0] %vm3_vm0, %v286_v0  }
   0x4   :  { %v289_v3 = vld [vmem:[%s671_s0 + $0x18] sm:$0x1f]   ;;  %273 = vst.msk [vmem:[%s672_s1 + $0x40] ss:$8 sm:$0xf] %vm3_vm0, %v283_v2   ;;  %s369_s7 = smov 123  }
   0x5   :  { %274 = vst.msk [vmem:[%s672_s1 + $0x40] ss:$8 sm:$0xf0] %vm3_vm0, %v283_v2   ;;  %v300_v4 = vld [vmem:[%s671_s0 + $0x18] sm:$0x1f]   ;;  %s370_s16 = smov 122  }
   0x6   :  { %55 = vrot.lane.b32.xlu1 %v289_v3, %s365_s10  ;;  %37 = vrot.lane.b32.xlu0 %v283_v2, %s365_s10  ;;  %v311_v5 = vld [vmem:[%s671_s0 + $0x18] sm:$0x1f]   ;;  %s371_s19 = smov 121  }
   0x7   :  { %v322_v6 = vld [vmem:[%s671_s0 + $0x18] sm:$0x1f]  }
   0x8   :  { %v333_v7 = vld [vmem:[%s671_s0 + $0x18] sm:$0x1f]  }
   0x9   :  { %v278_v8 = vld [vmem:[%s671_s0 + $0x18] sm:$0x1f]  }
   0xa   :  { %72 = vrot.lane.b32.xlu1 %v283_v2, %s366_s27  ;;  %63 = vrot.lane.b32.xlu0 %v27_v1, %s366_s27  ;;  %279 = vst.msk [vmem:[%s672_s1 + $0xc0] ss:$8 sm:$0xf] %vm3_vm0, %v278_v8   ;;  %280 = vst.msk [vmem:[%s672_s1 + $0xdc] sm:$0x10] %vm3_vm0, %v278_v8  }
   0xb   :  { %v344_v9 = vld [vmem:[%s671_s0 + $0x18] sm:$0x1f]  }
   0xc   :  { %v355_v10 = vld [vmem:[%s671_s0 + $0x18] sm:$0x1f]  }
   0xe   :  { %90 = vrot.lane.b32.xlu1 %v300_v4, %s366_s27  ;;  %81 = vrot.lane.b32.xlu0 %v286_v0, %s366_s27 }
  0x12   :  { %107 = vrot.lane.b32.xlu1 %v283_v2, %s367_s30  ;;  %98 = vrot.lane.b32.xlu0 %v27_v1, %s367_s30 }
  0x16   :  { %125 = vrot.lane.b32.xlu1 %v311_v5, %s367_s30  ;;  %116 = vrot.lane.b32.xlu0 %v286_v0, %s367_s30 }
  0x1a   :  { %142 = vrot.lane.b32.xlu1 %v283_v2, %s368_s4  ;;  %133 = vrot.lane.b32.xlu0 %v27_v1, %s368_s4 }
  0x1e   :  { %160 = vrot.lane.b32.xlu1 %v322_v6, %s368_s4  ;;  %151 = vrot.lane.b32.xlu0 %v286_v0, %s368_s4 }
  0x22   :  { %177 = vrot.lane.b32.xlu1 %v283_v2, %s369_s7  ;;  %168 = vrot.lane.b32.xlu0 %v27_v1, %s369_s7 }
  0x26   :  { %195 = vrot.lane.b32.xlu1 %v333_v7, %s369_s7  ;;  %186 = vrot.lane.b32.xlu0 %v286_v0, %s369_s7 }
  0x2a   :  { %212 = vrot.lane.b32.xlu1 %v283_v2, %s370_s16  ;;  %203 = vrot.lane.b32.xlu0 %v27_v1, %s370_s16 }
  0x2e   :  { %230 = vrot.lane.b32.xlu1 %v344_v9, %s370_s16  ;;  %221 = vrot.lane.b32.xlu0 %v286_v0, %s370_s16 }
  0x32   :  { %247 = vrot.lane.b32.xlu1 %v283_v2, %s371_s19  ;;  %238 = vrot.lane.b32.xlu0 %v27_v1, %s371_s19 }
  0x36   :  { %265 = vrot.lane.b32.xlu1 %v355_v10, %s371_s19  ;;  %256 = vrot.lane.b32.xlu0 %v286_v0, %s371_s19 }
  0x74   :  { %v47_v11 = vpop.permute.xlu1 %46   ;;  %v29_v12 = vpop.permute.xlu0 %28  }
  0x75   :  { %287 = vst.msk [vmem:[%s672_s1 + $0x81] ss:$8 sm:$0xf] %vm3_vm0, %v47_v11   ;;  %288 = vst.msk [vmem:[%s672_s1 + $0x81] ss:$8 sm:$0xf0] %vm3_vm0, %v47_v11  }
  0x76   :  { %281 = vst.msk [vmem:[%s672_s1 + $0x1] ss:$8 sm:$0xf] %vm3_vm0, %v29_v12   ;;  %282 = vst.msk [vmem:[%s672_s1 + $0x1] ss:$8 sm:$0xf0] %vm3_vm0, %v29_v12  }
  0x78   :  { %v56_v13 = vpop.permute.xlu1 %55   ;;  %v38_v14 = vpop.permute.xlu0 %37  }
  0x79   :  { %290 = vst.msk [vmem:[%s672_s1 + $0xc1] ss:$8 sm:$0xf] %vm3_vm0, %v56_v13   ;;  %291 = vst.msk [vmem:[%s672_s1 + $0xdd] sm:$0x10] %vm3_vm0, %v56_v13  }
  0x7a   :  { %284 = vst.msk [vmem:[%s672_s1 + $0x41] ss:$8 sm:$0xf] %vm3_vm0, %v38_v14   ;;  %285 = vst.msk [vmem:[%s672_s1 + $0x41] ss:$8 sm:$0xf0] %vm3_vm0, %v38_v14  }
  0x7c   :  { %v73_v15 = vpop.permute.xlu1 %72   ;;  %v64_v16 = vpop.permute.xlu0 %63  }
  0x7d   :  { %295 = vst.msk [vmem:[%s672_s1 + $0x42] ss:$8 sm:$0xf] %vm3_vm0, %v73_v15   ;;  %296 = vst.msk [vmem:[%s672_s1 + $0x42] ss:$8 sm:$0xf0] %vm3_vm0, %v73_v15  }
  0x7e   :  { %292 = vst.msk [vmem:[%s672_s1 + $0x2] ss:$8 sm:$0xf] %vm3_vm0, %v64_v16   ;;  %293 = vst.msk [vmem:[%s672_s1 + $0x2] ss:$8 sm:$0xf0] %vm3_vm0, %v64_v16  }
  0x80   :  { %v91_v17 = vpop.permute.xlu1 %90   ;;  %v82_v18 = vpop.permute.xlu0 %81  }
  0x81   :  { %301 = vst.msk [vmem:[%s672_s1 + $0xc2] ss:$8 sm:$0xf] %vm3_vm0, %v91_v17   ;;  %302 = vst.msk [vmem:[%s672_s1 + $0xde] sm:$0x10] %vm3_vm0, %v91_v17  }
  0x82   :  { %298 = vst.msk [vmem:[%s672_s1 + $0x82] ss:$8 sm:$0xf] %vm3_vm0, %v82_v18   ;;  %299 = vst.msk [vmem:[%s672_s1 + $0x82] ss:$8 sm:$0xf0] %vm3_vm0, %v82_v18  }
  0x84   :  { %v108_v19 = vpop.permute.xlu1 %107   ;;  %v99_v20 = vpop.permute.xlu0 %98  }
  0x85   :  { %306 = vst.msk [vmem:[%s672_s1 + $0x43] ss:$8 sm:$0xf] %vm3_vm0, %v108_v19   ;;  %307 = vst.msk [vmem:[%s672_s1 + $0x43] ss:$8 sm:$0xf0] %vm3_vm0, %v108_v19  }
  0x86   :  { %303 = vst.msk [vmem:[%s672_s1 + $0x3] ss:$8 sm:$0xf] %vm3_vm0, %v99_v20   ;;  %304 = vst.msk [vmem:[%s672_s1 + $0x3] ss:$8 sm:$0xf0] %vm3_vm0, %v99_v20  }
  0x88   :  { %v126_v21 = vpop.permute.xlu1 %125   ;;  %v117_v22 = vpop.permute.xlu0 %116  }
  0x89   :  { %312 = vst.msk [vmem:[%s672_s1 + $0xc3] ss:$8 sm:$0xf] %vm3_vm0, %v126_v21   ;;  %313 = vst.msk [vmem:[%s672_s1 + $0xdf] sm:$0x10] %vm3_vm0, %v126_v21  }
  0x8a   :  { %309 = vst.msk [vmem:[%s672_s1 + $0x83] ss:$8 sm:$0xf] %vm3_vm0, %v117_v22   ;;  %310 = vst.msk [vmem:[%s672_s1 + $0x83] ss:$8 sm:$0xf0] %vm3_vm0, %v117_v22  }
  0x8c   :  { %v143_v23 = vpop.permute.xlu1 %142   ;;  %v134_v24 = vpop.permute.xlu0 %133  }
  0x8d   :  { %317 = vst.msk [vmem:[%s672_s1 + $0x44] ss:$8 sm:$0xf] %vm3_vm0, %v143_v23   ;;  %318 = vst.msk [vmem:[%s672_s1 + $0x44] ss:$8 sm:$0xf0] %vm3_vm0, %v143_v23  }
  0x8e   :  { %314 = vst.msk [vmem:[%s672_s1 + $0x4] ss:$8 sm:$0xf] %vm3_vm0, %v134_v24   ;;  %315 = vst.msk [vmem:[%s672_s1 + $0x4] ss:$8 sm:$0xf0] %vm3_vm0, %v134_v24  }
  0x90   :  { %v161_v25 = vpop.permute.xlu1 %160   ;;  %v152_v26 = vpop.permute.xlu0 %151  }
  0x91   :  { %323 = vst.msk [vmem:[%s672_s1 + $0xc4] ss:$8 sm:$0xf] %vm3_vm0, %v161_v25   ;;  %324 = vst.msk [vmem:[%s672_s1 + $0xe0] sm:$0x10] %vm3_vm0, %v161_v25  }
  0x92   :  { %320 = vst.msk [vmem:[%s672_s1 + $0x84] ss:$8 sm:$0xf] %vm3_vm0, %v152_v26   ;;  %321 = vst.msk [vmem:[%s672_s1 + $0x84] ss:$8 sm:$0xf0] %vm3_vm0, %v152_v26  }
  0x94   :  { %v178_v27 = vpop.permute.xlu1 %177   ;;  %v169_v28 = vpop.permute.xlu0 %168  }
  0x95   :  { %328 = vst.msk [vmem:[%s672_s1 + $0x45] ss:$8 sm:$0xf] %vm3_vm0, %v178_v27   ;;  %329 = vst.msk [vmem:[%s672_s1 + $0x45] ss:$8 sm:$0xf0] %vm3_vm0, %v178_v27  }
  0x96   :  { %325 = vst.msk [vmem:[%s672_s1 + $0x5] ss:$8 sm:$0xf] %vm3_vm0, %v169_v28   ;;  %326 = vst.msk [vmem:[%s672_s1 + $0x5] ss:$8 sm:$0xf0] %vm3_vm0, %v169_v28  }
  0x98   :  { %v196_v29 = vpop.permute.xlu1 %195   ;;  %v187_v30 = vpop.permute.xlu0 %186  }
  0x99   :  { %334 = vst.msk [vmem:[%s672_s1 + $0xc5] ss:$8 sm:$0xf] %vm3_vm0, %v196_v29   ;;  %335 = vst.msk [vmem:[%s672_s1 + $0xe1] sm:$0x10] %vm3_vm0, %v196_v29  }
  0x9a   :  { %331 = vst.msk [vmem:[%s672_s1 + $0x85] ss:$8 sm:$0xf] %vm3_vm0, %v187_v30   ;;  %332 = vst.msk [vmem:[%s672_s1 + $0x85] ss:$8 sm:$0xf0] %vm3_vm0, %v187_v30  }
  0x9c   :  { %v213_v31 = vpop.permute.xlu1 %212   ;;  %v204_v32 = vpop.permute.xlu0 %203  }
  0x9d   :  { %339 = vst.msk [vmem:[%s672_s1 + $0x46] ss:$8 sm:$0xf] %vm3_vm0, %v213_v31   ;;  %340 = vst.msk [vmem:[%s672_s1 + $0x46] ss:$8 sm:$0xf0] %vm3_vm0, %v213_v31  }
  0x9e   :  { %336 = vst.msk [vmem:[%s672_s1 + $0x6] ss:$8 sm:$0xf] %vm3_vm0, %v204_v32   ;;  %337 = vst.msk [vmem:[%s672_s1 + $0x6] ss:$8 sm:$0xf0] %vm3_vm0, %v204_v32  }
  0xa0   :  { %v231_v33 = vpop.permute.xlu1 %230   ;;  %v222_v34 = vpop.permute.xlu0 %221  }
  0xa1   :  { %345 = vst.msk [vmem:[%s672_s1 + $0xc6] ss:$8 sm:$0xf] %vm3_vm0, %v231_v33   ;;  %346 = vst.msk [vmem:[%s672_s1 + $0xe2] sm:$0x10] %vm3_vm0, %v231_v33  }
  0xa2   :  { %342 = vst.msk [vmem:[%s672_s1 + $0x86] ss:$8 sm:$0xf] %vm3_vm0, %v222_v34   ;;  %343 = vst.msk [vmem:[%s672_s1 + $0x86] ss:$8 sm:$0xf0] %vm3_vm0, %v222_v34  }
  0xa4   :  { %v248_v35 = vpop.permute.xlu1 %247   ;;  %v239_v36 = vpop.permute.xlu0 %238  }
  0xa5   :  { %350 = vst.msk [vmem:[%s672_s1 + $0x47] ss:$8 sm:$0xf] %vm3_vm0, %v248_v35   ;;  %351 = vst.msk [vmem:[%s672_s1 + $0x47] ss:$8 sm:$0xf0] %vm3_vm0, %v248_v35  }
  0xa6   :  { %347 = vst.msk [vmem:[%s672_s1 + $0x7] ss:$8 sm:$0xf] %vm3_vm0, %v239_v36   ;;  %348 = vst.msk [vmem:[%s672_s1 + $0x7] ss:$8 sm:$0xf0] %vm3_vm0, %v239_v36  }
  0xa8   :  { %v266_v37 = vpop.permute.xlu1 %265   ;;  %v257_v38 = vpop.permute.xlu0 %256  }
  0xa9   :  { %356 = vst.msk [vmem:[%s672_s1 + $0xc7] ss:$8 sm:$0xf] %vm3_vm0, %v266_v37   ;;  %357 = vst.msk [vmem:[%s672_s1 + $0xe3] sm:$0x10] %vm3_vm0, %v266_v37  }
  0xaa   :  { %353 = vst.msk [vmem:[%s672_s1 + $0x87] ss:$8 sm:$0xf] %vm3_vm0, %v257_v38   ;;  %354 = vst.msk [vmem:[%s672_s1 + $0x87] ss:$8 sm:$0xf0] %vm3_vm0, %v257_v38  }

// kernel: tile.18
= control target key start
LH: loop header
LB: loop body
LE: loop exit
PB: predicated region body
PF: predicated region fallthrough
CT: control target
= control target key end

     0   :  { %s28_s0 = inlined_call_operand.vmem [shape: f32[16], index: 0, kind: input, shape index: {}]   ;;  %s29_s1 = inlined_call_operand.vmem [shape: f32[12,16], index: 1, kind: output, shape index: {}]  }
   0x1   :  { %v4_v0 = vld [vmem:[%s28_s0] ss:$0 sm:$0xff] }
   0x2   :  { %5 = vst [vmem:[%s29_s1] sm:$0xff] %v4_v0  ;;  %8 = vst [vmem:[%s29_s1 + $0x8] sm:$0xff] %v4_v0 }

// kernel: tile.1
= control target key start
LH: loop header
LB: loop body
LE: loop exit
PB: predicated region body
PF: predicated region fallthrough
CT: control target
= control target key end

     0   :  { %vm3_vm0 = vcmask 7168   ;;  %s453_s8 = smov 126   ;;  %s454_s9 = smov 127   ;;  %s934_s0 = inlined_call_operand.vmem [shape: f32[12,16], index: 0, kind: input, shape index: {}]   ;;  %s935_s1 = inlined_call_operand.vmem [shape: f32[192,1], index: 1, kind: output, shape index: {}]  }
   0x1   :  { %v481_v0 = vld [vmem:[%s934_s0] sm:$0xff]   ;;  %v344_v1 = vld [vmem:[%s934_s0 + $0x8] sm:$0xf]   ;;  %s455_s24 = smov 125   ;;  %s456_s27 = smov 124  }
   0x2   :  { %37 = vrot.lane.b32.xlu1 %v481_v0, %s453_s8  ;;  %16 = vrot.lane.b32.xlu0 %v481_v0, %s454_s9  ;;  %4 = vst.msk [vmem:[%s935_s1] ss:$16 sm:$0x3] %vm3_vm0, %v481_v0   ;;  %5 = vst.msk [vmem:[%s935_s1] ss:$16 sm:$0xc] %vm3_vm0, %v481_v0  }
   0x3   :  { %6 = vst.msk [vmem:[%s935_s1] ss:$16 sm:$0x30] %vm3_vm0, %v481_v0   ;;  %7 = vst.msk [vmem:[%s935_s1] ss:$16 sm:$0xc0] %vm3_vm0, %v481_v0  }
   0x4   :  { %v337_v2 = vld [vmem:[%s934_s0 + $0x8] sm:$0xf]   ;;  %s457_s30 = smov 123   ;;  %s458_s4 = smov 122  }
   0x5   :  { %v351_v3 = vld [vmem:[%s934_s0 + $0x8] sm:$0xf]   ;;  %s459_s7 = smov 121   ;;  %s460_s10 = smov 120  }
   0x6   :  { %50 = vrot.lane.b32.xlu1 %v344_v1, %s453_s8  ;;  %29 = vrot.lane.b32.xlu0 %v337_v2, %s454_s9  ;;  %v358_v4 = vld [vmem:[%s934_s0 + $0x8] sm:$0xf]   ;;  %s461_s13 = smov 119   ;;  %s462_s16 = smov 118  }
   0x7   :  { %v365_v5 = vld [vmem:[%s934_s0 + $0x8] sm:$0xf]   ;;  %s463_s19 = smov 117   ;;  %s464_s28 = smov 116  }
   0x8   :  { %v372_v6 = vld [vmem:[%s934_s0 + $0x8] sm:$0xf]   ;;  %s465_s2 = smov 115   ;;  %s466_s5 = smov 114  }
   0x9   :  { %v379_v7 = vld [vmem:[%s934_s0 + $0x8] sm:$0xf]  }
   0xa   :  { %71 = vrot.lane.b32.xlu1 %v351_v3, %s455_s24  ;;  %58 = vrot.lane.b32.xlu0 %v481_v0, %s455_s24  ;;  %v386_v8 = vld [vmem:[%s934_s0 + $0x8] sm:$0xf]  }
   0xb   :  { %v393_v9 = vld [vmem:[%s934_s0 + $0x8] sm:$0xf]  }
   0xc   :  { %v400_v10 = vld [vmem:[%s934_s0 + $0x8] sm:$0xf]  }
   0xd   :  { %v407_v11 = vld [vmem:[%s934_s0 + $0x8] sm:$0xf]  }
   0xe   :  { %92 = vrot.lane.b32.xlu1 %v358_v4, %s456_s27  ;;  %79 = vrot.lane.b32.xlu0 %v481_v0, %s456_s27  ;;  %v414_v12 = vld [vmem:[%s934_s0 + $0x8] sm:$0xf]  }
   0xf   :  { %v330_v13 = vld [vmem:[%s934_s0 + $0x8] sm:$0xf]  }
  0x10   :  { %331 = vst.msk [vmem:[%s935_s1 + $0x80] ss:$16 sm:$0x3] %vm3_vm0, %v330_v13   ;;  %332 = vst.msk [vmem:[%s935_s1 + $0x80] ss:$16 sm:$0xc] %vm3_vm0, %v330_v13  }
  0x11   :  { %v421_v14 = vld [vmem:[%s934_s0 + $0x8] sm:$0xf]  }
  0x12   :  { %113 = vrot.lane.b32.xlu1 %v365_v5, %s457_s30  ;;  %100 = vrot.lane.b32.xlu0 %v481_v0, %s457_s30  ;;  %v428_v15 = vld [vmem:[%s934_s0 + $0x8] sm:$0xf]  }
  0x13   :  { %v435_v16 = vld [vmem:[%s934_s0 + $0x8] sm:$0xf]   ;;  %s467_s0 = smov 113  }
  0x16   :  { %134 = vrot.lane.b32.xlu1 %v372_v6, %s458_s4  ;;  %121 = vrot.lane.b32.xlu0 %v481_v0, %s458_s4 }
  0x1a   :  { %155 = vrot.lane.b32.xlu1 %v379_v7, %s459_s7  ;;  %142 = vrot.lane.b32.xlu0 %v481_v0, %s459_s7 }
  0x1e   :  { %176 = vrot.lane.b32.xlu1 %v386_v8, %s460_s10  ;;  %163 = vrot.lane.b32.xlu0 %v481_v0, %s460_s10 }
  0x22   :  { %197 = vrot.lane.b32.xlu1 %v393_v9, %s461_s13  ;;  %184 = vrot.lane.b32.xlu0 %v481_v0, %s461_s13 }
  0x26   :  { %218 = vrot.lane.b32.xlu1 %v400_v10, %s462_s16  ;;  %205 = vrot.lane.b32.xlu0 %v481_v0, %s462_s16 }
  0x2a   :  { %239 = vrot.lane.b32.xlu1 %v407_v11, %s463_s19  ;;  %226 = vrot.lane.b32.xlu0 %v481_v0, %s463_s19 }
  0x2e   :  { %260 = vrot.lane.b32.xlu1 %v414_v12, %s464_s28  ;;  %247 = vrot.lane.b32.xlu0 %v481_v0, %s464_s28 }
  0x32   :  { %281 = vrot.lane.b32.xlu1 %v421_v14, %s465_s2  ;;  %268 = vrot.lane.b32.xlu0 %v481_v0, %s465_s2 }
  0x36   :  { %302 = vrot.lane.b32.xlu1 %v428_v15, %s466_s5  ;;  %289 = vrot.lane.b32.xlu0 %v481_v0, %s466_s5 }
  0x3a   :  { %323 = vrot.lane.b32.xlu1 %v435_v16, %s467_s0  ;;  %310 = vrot.lane.b32.xlu0 %v481_v0, %s467_s0 }
  0x74   :  { %v38_v17 = vpop.permute.xlu1 %37   ;;  %v17_v18 = vpop.permute.xlu0 %16  }
  0x75   :  { %340 = vst.msk [vmem:[%s935_s1 + $0x2] ss:$16 sm:$0x3] %vm3_vm0, %v38_v17   ;;  %341 = vst.msk [vmem:[%s935_s1 + $0x2] ss:$16 sm:$0xc] %vm3_vm0, %v38_v17  }
  0x76   :  { %342 = vst.msk [vmem:[%s935_s1 + $0x2] ss:$16 sm:$0x30] %vm3_vm0, %v38_v17   ;;  %343 = vst.msk [vmem:[%s935_s1 + $0x2] ss:$16 sm:$0xc0] %vm3_vm0, %v38_v17  }
  0x77   :  { %333 = vst.msk [vmem:[%s935_s1 + $0x1] ss:$16 sm:$0x3] %vm3_vm0, %v17_v18   ;;  %334 = vst.msk [vmem:[%s935_s1 + $0x1] ss:$16 sm:$0xc] %vm3_vm0, %v17_v18  }
  0x78   :  { %335 = vst.msk [vmem:[%s935_s1 + $0x1] ss:$16 sm:$0x30] %vm3_vm0, %v17_v18   ;;  %336 = vst.msk [vmem:[%s935_s1 + $0x1] ss:$16 sm:$0xc0] %vm3_vm0, %v17_v18   ;;  %v51_v19 = vpop.permute.xlu1 %50   ;;  %v30_v20 = vpop.permute.xlu0 %29  }
  0x79   :  { %345 = vst.msk [vmem:[%s935_s1 + $0x82] ss:$16 sm:$0x3] %vm3_vm0, %v51_v19   ;;  %346 = vst.msk [vmem:[%s935_s1 + $0x82] ss:$16 sm:$0xc] %vm3_vm0, %v51_v19  }
  0x7a   :  { %338 = vst.msk [vmem:[%s935_s1 + $0x81] ss:$16 sm:$0x3] %vm3_vm0, %v30_v20   ;;  %339 = vst.msk [vmem:[%s935_s1 + $0x81] ss:$16 sm:$0xc] %vm3_vm0, %v30_v20  }
  0x7c   :  { %v72_v21 = vpop.permute.xlu1 %71   ;;  %v59_v22 = vpop.permute.xlu0 %58  }
  0x7d   :  { %352 = vst.msk [vmem:[%s935_s1 + $0x83] ss:$16 sm:$0x3] %vm3_vm0, %v72_v21   ;;  %353 = vst.msk [vmem:[%s935_s1 + $0x83] ss:$16 sm:$0xc] %vm3_vm0, %v72_v21  }
  0x7e   :  { %347 = vst.msk [vmem:[%s935_s1 + $0x3] ss:$16 sm:$0x3] %vm3_vm0, %v59_v22   ;;  %348 = vst.msk [vmem:[%s935_s1 + $0x3] ss:$16 sm:$0xc] %vm3_vm0, %v59_v22  }
  0x7f   :  { %349 = vst.msk [vmem:[%s935_s1 + $0x3] ss:$16 sm:$0x30] %vm3_vm0, %v59_v22   ;;  %350 = vst.msk [vmem:[%s935_s1 + $0x3] ss:$16 sm:$0xc0] %vm3_vm0, %v59_v22  }
  0x80   :  { %v93_v23 = vpop.permute.xlu1 %92   ;;  %v80_v24 = vpop.permute.xlu0 %79  }
  0x81   :  { %359 = vst.msk [vmem:[%s935_s1 + $0x84] ss:$16 sm:$0x3] %vm3_vm0, %v93_v23   ;;  %360 = vst.msk [vmem:[%s935_s1 + $0x84] ss:$16 sm:$0xc] %vm3_vm0, %v93_v23  }
  0x82   :  { %354 = vst.msk [vmem:[%s935_s1 + $0x4] ss:$16 sm:$0x3] %vm3_vm0, %v80_v24   ;;  %355 = vst.msk [vmem:[%s935_s1 + $0x4] ss:$16 sm:$0xc] %vm3_vm0, %v80_v24  }
  0x83   :  { %356 = vst.msk [vmem:[%s935_s1 + $0x4] ss:$16 sm:$0x30] %vm3_vm0, %v80_v24   ;;  %357 = vst.msk [vmem:[%s935_s1 + $0x4] ss:$16 sm:$0xc0] %vm3_vm0, %v80_v24  }
  0x84   :  { %v114_v25 = vpop.permute.xlu1 %113   ;;  %v101_v26 = vpop.permute.xlu0 %100  }
  0x85   :  { %366 = vst.msk [vmem:[%s935_s1 + $0x85] ss:$16 sm:$0x3] %vm3_vm0, %v114_v25   ;;  %367 = vst.msk [vmem:[%s935_s1 + $0x85] ss:$16 sm:$0xc] %vm3_vm0, %v114_v25  }
  0x86   :  { %361 = vst.msk [vmem:[%s935_s1 + $0x5] ss:$16 sm:$0x3] %vm3_vm0, %v101_v26   ;;  %362 = vst.msk [vmem:[%s935_s1 + $0x5] ss:$16 sm:$0xc] %vm3_vm0, %v101_v26  }
  0x87   :  { %363 = vst.msk [vmem:[%s935_s1 + $0x5] ss:$16 sm:$0x30] %vm3_vm0, %v101_v26   ;;  %364 = vst.msk [vmem:[%s935_s1 + $0x5] ss:$16 sm:$0xc0] %vm3_vm0, %v101_v26  }
  0x88   :  { %v135_v27 = vpop.permute.xlu1 %134   ;;  %v122_v28 = vpop.permute.xlu0 %121  }
  0x89   :  { %373 = vst.msk [vmem:[%s935_s1 + $0x86] ss:$16 sm:$0x3] %vm3_vm0, %v135_v27   ;;  %374 = vst.msk [vmem:[%s935_s1 + $0x86] ss:$16 sm:$0xc] %vm3_vm0, %v135_v27  }
  0x8a   :  { %368 = vst.msk [vmem:[%s935_s1 + $0x6] ss:$16 sm:$0x3] %vm3_vm0, %v122_v28   ;;  %369 = vst.msk [vmem:[%s935_s1 + $0x6] ss:$16 sm:$0xc] %vm3_vm0, %v122_v28  }
  0x8b   :  { %370 = vst.msk [vmem:[%s935_s1 + $0x6] ss:$16 sm:$0x30] %vm3_vm0, %v122_v28   ;;  %371 = vst.msk [vmem:[%s935_s1 + $0x6] ss:$16 sm:$0xc0] %vm3_vm0, %v122_v28  }
  0x8c   :  { %v156_v29 = vpop.permute.xlu1 %155   ;;  %v143_v30 = vpop.permute.xlu0 %142  }
  0x8d   :  { %380 = vst.msk [vmem:[%s935_s1 + $0x87] ss:$16 sm:$0x3] %vm3_vm0, %v156_v29   ;;  %381 = vst.msk [vmem:[%s935_s1 + $0x87] ss:$16 sm:$0xc] %vm3_vm0, %v156_v29  }
  0x8e   :  { %375 = vst.msk [vmem:[%s935_s1 + $0x7] ss:$16 sm:$0x3] %vm3_vm0, %v143_v30   ;;  %376 = vst.msk [vmem:[%s935_s1 + $0x7] ss:$16 sm:$0xc] %vm3_vm0, %v143_v30  }
  0x8f   :  { %377 = vst.msk [vmem:[%s935_s1 + $0x7] ss:$16 sm:$0x30] %vm3_vm0, %v143_v30   ;;  %378 = vst.msk [vmem:[%s935_s1 + $0x7] ss:$16 sm:$0xc0] %vm3_vm0, %v143_v30  }
  0x90   :  { %v177_v31 = vpop.permute.xlu1 %176   ;;  %v164_v32 = vpop.permute.xlu0 %163  }
  0x91   :  { %387 = vst.msk [vmem:[%s935_s1 + $0x88] ss:$16 sm:$0x3] %vm3_vm0, %v177_v31   ;;  %388 = vst.msk [vmem:[%s935_s1 + $0x88] ss:$16 sm:$0xc] %vm3_vm0, %v177_v31  }
  0x92   :  { %382 = vst.msk [vmem:[%s935_s1 + $0x8] ss:$16 sm:$0x3] %vm3_vm0, %v164_v32   ;;  %383 = vst.msk [vmem:[%s935_s1 + $0x8] ss:$16 sm:$0xc] %vm3_vm0, %v164_v32  }
  0x93   :  { %384 = vst.msk [vmem:[%s935_s1 + $0x8] ss:$16 sm:$0x30] %vm3_vm0, %v164_v32   ;;  %385 = vst.msk [vmem:[%s935_s1 + $0x8] ss:$16 sm:$0xc0] %vm3_vm0, %v164_v32  }
  0x94   :  { %v198_v33 = vpop.permute.xlu1 %197   ;;  %v185_v34 = vpop.permute.xlu0 %184  }
  0x95   :  { %394 = vst.msk [vmem:[%s935_s1 + $0x89] ss:$16 sm:$0x3] %vm3_vm0, %v198_v33   ;;  %395 = vst.msk [vmem:[%s935_s1 + $0x89] ss:$16 sm:$0xc] %vm3_vm0, %v198_v33  }
  0x96   :  { %389 = vst.msk [vmem:[%s935_s1 + $0x9] ss:$16 sm:$0x3] %vm3_vm0, %v185_v34   ;;  %390 = vst.msk [vmem:[%s935_s1 + $0x9] ss:$16 sm:$0xc] %vm3_vm0, %v185_v34  }
  0x97   :  { %391 = vst.msk [vmem:[%s935_s1 + $0x9] ss:$16 sm:$0x30] %vm3_vm0, %v185_v34   ;;  %392 = vst.msk [vmem:[%s935_s1 + $0x9] ss:$16 sm:$0xc0] %vm3_vm0, %v185_v34  }
  0x98   :  { %v219_v35 = vpop.permute.xlu1 %218   ;;  %v206_v36 = vpop.permute.xlu0 %205  }
  0x99   :  { %401 = vst.msk [vmem:[%s935_s1 + $0x8a] ss:$16 sm:$0x3] %vm3_vm0, %v219_v35   ;;  %402 = vst.msk [vmem:[%s935_s1 + $0x8a] ss:$16 sm:$0xc] %vm3_vm0, %v219_v35  }
  0x9a   :  { %396 = vst.msk [vmem:[%s935_s1 + $0xa] ss:$16 sm:$0x3] %vm3_vm0, %v206_v36   ;;  %397 = vst.msk [vmem:[%s935_s1 + $0xa] ss:$16 sm:$0xc] %vm3_vm0, %v206_v36  }
  0x9b   :  { %398 = vst.msk [vmem:[%s935_s1 + $0xa] ss:$16 sm:$0x30] %vm3_vm0, %v206_v36   ;;  %399 = vst.msk [vmem:[%s935_s1 + $0xa] ss:$16 sm:$0xc0] %vm3_vm0, %v206_v36  }
  0x9c   :  { %v240_v37 = vpop.permute.xlu1 %239   ;;  %v227_v38 = vpop.permute.xlu0 %226  }
  0x9d   :  { %408 = vst.msk [vmem:[%s935_s1 + $0x8b] ss:$16 sm:$0x3] %vm3_vm0, %v240_v37   ;;  %409 = vst.msk [vmem:[%s935_s1 + $0x8b] ss:$16 sm:$0xc] %vm3_vm0, %v240_v37  }
  0x9e   :  { %403 = vst.msk [vmem:[%s935_s1 + $0xb] ss:$16 sm:$0x3] %vm3_vm0, %v227_v38   ;;  %404 = vst.msk [vmem:[%s935_s1 + $0xb] ss:$16 sm:$0xc] %vm3_vm0, %v227_v38  }
  0x9f   :  { %405 = vst.msk [vmem:[%s935_s1 + $0xb] ss:$16 sm:$0x30] %vm3_vm0, %v227_v38   ;;  %406 = vst.msk [vmem:[%s935_s1 + $0xb] ss:$16 sm:$0xc0] %vm3_vm0, %v227_v38  }
  0xa0   :  { %v261_v39 = vpop.permute.xlu1 %260   ;;  %v248_v40 = vpop.permute.xlu0 %247  }
  0xa1   :  { %415 = vst.msk [vmem:[%s935_s1 + $0x8c] ss:$16 sm:$0x3] %vm3_vm0, %v261_v39   ;;  %416 = vst.msk [vmem:[%s935_s1 + $0x8c] ss:$16 sm:$0xc] %vm3_vm0, %v261_v39  }
  0xa2   :  { %410 = vst.msk [vmem:[%s935_s1 + $0xc] ss:$16 sm:$0x3] %vm3_vm0, %v248_v40   ;;  %411 = vst.msk [vmem:[%s935_s1 + $0xc] ss:$16 sm:$0xc] %vm3_vm0, %v248_v40  }
  0xa3   :  { %412 = vst.msk [vmem:[%s935_s1 + $0xc] ss:$16 sm:$0x30] %vm3_vm0, %v248_v40   ;;  %413 = vst.msk [vmem:[%s935_s1 + $0xc] ss:$16 sm:$0xc0] %vm3_vm0, %v248_v40  }
  0xa4   :  { %v282_v41 = vpop.permute.xlu1 %281   ;;  %v269_v42 = vpop.permute.xlu0 %268  }
  0xa5   :  { %422 = vst.msk [vmem:[%s935_s1 + $0x8d] ss:$16 sm:$0x3] %vm3_vm0, %v282_v41   ;;  %423 = vst.msk [vmem:[%s935_s1 + $0x8d] ss:$16 sm:$0xc] %vm3_vm0, %v282_v41  }
  0xa6   :  { %417 = vst.msk [vmem:[%s935_s1 + $0xd] ss:$16 sm:$0x3] %vm3_vm0, %v269_v42   ;;  %418 = vst.msk [vmem:[%s935_s1 + $0xd] ss:$16 sm:$0xc] %vm3_vm0, %v269_v42  }
  0xa7   :  { %419 = vst.msk [vmem:[%s935_s1 + $0xd] ss:$16 sm:$0x30] %vm3_vm0, %v269_v42   ;;  %420 = vst.msk [vmem:[%s935_s1 + $0xd] ss:$16 sm:$0xc0] %vm3_vm0, %v269_v42  }
  0xa8   :  { %v303_v43 = vpop.permute.xlu1 %302   ;;  %v290_v44 = vpop.permute.xlu0 %289  }
  0xa9   :  { %429 = vst.msk [vmem:[%s935_s1 + $0x8e] ss:$16 sm:$0x3] %vm3_vm0, %v303_v43   ;;  %430 = vst.msk [vmem:[%s935_s1 + $0x8e] ss:$16 sm:$0xc] %vm3_vm0, %v303_v43  }
  0xaa   :  { %424 = vst.msk [vmem:[%s935_s1 + $0xe] ss:$16 sm:$0x3] %vm3_vm0, %v290_v44   ;;  %425 = vst.msk [vmem:[%s935_s1 + $0xe] ss:$16 sm:$0xc] %vm3_vm0, %v290_v44  }
  0xab   :  { %426 = vst.msk [vmem:[%s935_s1 + $0xe] ss:$16 sm:$0x30] %vm3_vm0, %v290_v44   ;;  %427 = vst.msk [vmem:[%s935_s1 + $0xe] ss:$16 sm:$0xc0] %vm3_vm0, %v290_v44  }
  0xac   :  { %v324_v45 = vpop.permute.xlu1 %323   ;;  %v311_v46 = vpop.permute.xlu0 %310  }
  0xad   :  { %436 = vst.msk [vmem:[%s935_s1 + $0x8f] ss:$16 sm:$0x3] %vm3_vm0, %v324_v45   ;;  %437 = vst.msk [vmem:[%s935_s1 + $0x8f] ss:$16 sm:$0xc] %vm3_vm0, %v324_v45  }
  0xae   :  { %431 = vst.msk [vmem:[%s935_s1 + $0xf] ss:$16 sm:$0x3] %vm3_vm0, %v311_v46   ;;  %432 = vst.msk [vmem:[%s935_s1 + $0xf] ss:$16 sm:$0xc] %vm3_vm0, %v311_v46  }
  0xaf   :  { %433 = vst.msk [vmem:[%s935_s1 + $0xf] ss:$16 sm:$0x30] %vm3_vm0, %v311_v46   ;;  %434 = vst.msk [vmem:[%s935_s1 + $0xf] ss:$16 sm:$0xc0] %vm3_vm0, %v311_v46  }

// kernel: tcn_networks_forward.1
= control target key start
LH: loop header
LB: loop body
LE: loop exit
PB: predicated region body
PF: predicated region fallthrough
CT: control target
= control target key end

     0   :  { %s1977_s24 = smov 0   ;;  %s1979_s25 = smov 0   ;;  %s2607_s0 = inlined_call_operand.vmem [shape: f32[64,512], index: 0, kind: input, shape index: {}]   ;;  %s2608_s1 = inlined_call_operand.vmem [shape: f32[232,64], index: 1, kind: input, shape index: {}]   ;;  %s2609_s2 = inlined_call_operand.vmem [shape: f32[232,1], index: 2, kind: input, shape index: {}]   ;;  %s2610_s3 = inlined_call_operand.vmem [shape: f32[192,232], index: 3, kind: input, shape index: {}]   ;;  %s2611_s4 = inlined_call_operand.vmem [shape: f32[192,1], index: 4, kind: input, shape index: {}]   ;;  %s2612_s5 = inlined_call_operand.vmem [shape: f32[32,192], index: 5, kind: input, shape index: {}]   ;;  %s2613_s6 = inlined_call_operand.vmem [shape: f32[32,1], index: 6, kind: input, shape index: {}]   ;;  %s2614_s7 = inlined_call_operand.vmem [shape: f32[32,512], index: 7, kind: output, shape index: {}]  }
   0x1   :  { %s1981_s26 = smov 0  }
   0x2 LB: > { %s1689_s27 = sadd.s32 4294967295, %s1933_s26   ;;  %s1994_s28 = sadd.s32 1, %s1933_s26   ;;  %s1933_s26 = sphi %s1981_s26, %s2618_s26   ;;  %s1929_s25 = sphi %s1979_s25, %s2617_s25   ;;  %s1925_s24 = sphi %s1977_s24, %s2616_s24  }
   0x3   : > { %s21_s29 = ssub.s32 %s1933_s26, %s1994_s28  ;;  %s24_s30 = sadd.s32 1, %s1929_s25 }
   0x4   : > { %p22_p0 = scmp.eq.s32.totalorder %s21_s29, 0  ;;  %p31_p1 = scmp.ne.s32.totalorder %s1929_s25, %s1925_s24 }
   0x5   : > { %p32_p2 = scmp.eq.s32.totalorder %s1933_s26, 0  ;;  %p187_p3 = scmp.eq.s32.totalorder %s1689_s27, 1 }
   0x6   : > { %s2005_s8 = scalar_select %p22_p0, %s1929_s25, %s24_s30  }
   0x7   : > { %p33_p4 = por %p32_p2, %p31_p1  ;;  %p2007_p5 = por %p187_p3, %p31_p1 }
   0x8   : > { %p1692_p6 = scmp.ge.s32.totalorder %s1933_s26, 2 }
   0xa   : > { %227 = sbr.rel (%p1692_p6) target bundleno = 29 (0x1d), region = 40 }
  0x11   : > { %230 = sbr.rel (!%p33_p4) target bundleno = 29 (0x1d), region = 44  ;;  %s232_s10 = sand.u32 (%p33_p4), 1, %s1929_s25  }
  0x12   : > { %s1761_s11 = sshll.u32 (%p33_p4), %s1933_s26, 4  ;;  %s1693_s12 = sshll.u32 (%p33_p4), %s232_s10, 7 }
  0x13   : > { %s2017_s15 = scalar_lea.vmem (%p33_p4), %s2607_s0, %s1761_s11  ;;  %s234_s16 = scalar_lea.vmem (%p33_p4), [#allocation2], %s1693_s12 }
  0x14   : > { %v250_v0 = vld [vmem:[%s2017_s15] sm:$0xff] (%p33_p4)  ;;  %v252_v1 = vld [vmem:[%s2017_s15 + $0x8] sm:$0xff] (%p33_p4) }
  0x15   : > { %v254_v2 = vld [vmem:[%s2017_s15 + $0x20] sm:$0xff] (%p33_p4)  ;;  %251 = vst [vmem:[%s234_s16] sm:$0xff] (%p33_p4), %v250_v0  ;;  %253 = vst [vmem:[%s234_s16 + $0x8] sm:$0xff] (%p33_p4), %v252_v1  ;;  %v256_v3 = vld [vmem:[%s2017_s15 + $0x28] sm:$0xff] (%p33_p4) }
  0x16   : > { %255 = vst [vmem:[%s234_s16 + $0x10] sm:$0xff] (%p33_p4), %v254_v2  ;;  %v258_v4 = vld [vmem:[%s2017_s15 + $0x40] sm:$0xff] (%p33_p4)  ;;  %v260_v5 = vld [vmem:[%s2017_s15 + $0x48] sm:$0xff] (%p33_p4)  ;;  %257 = vst [vmem:[%s234_s16 + $0x18] sm:$0xff] (%p33_p4), %v256_v3 }
  0x17   : > { %259 = vst [vmem:[%s234_s16 + $0x20] sm:$0xff] (%p33_p4), %v258_v4  ;;  %261 = vst [vmem:[%s234_s16 + $0x28] sm:$0xff] (%p33_p4), %v260_v5  ;;  %v262_v6 = vld [vmem:[%s2017_s15 + $0x60] sm:$0xff] (%p33_p4)  ;;  %v264_v7 = vld [vmem:[%s2017_s15 + $0x68] sm:$0xff] (%p33_p4) }
  0x18   : > { %v266_v8 = vld [vmem:[%s2017_s15 + $0x80] sm:$0xff]  ;;  %263 = vst [vmem:[%s234_s16 + $0x30] sm:$0xff] %v262_v6  ;;  %265 = vst [vmem:[%s234_s16 + $0x38] sm:$0xff] %v264_v7  ;;  %v268_v9 = vld [vmem:[%s2017_s15 + $0x88] sm:$0xff] }
  0x19   : > { %267 = vst [vmem:[%s234_s16 + $0x40] sm:$0xff] %v266_v8  ;;  %v270_v10 = vld [vmem:[%s2017_s15 + $0xa0] sm:$0xff]  ;;  %v272_v11 = vld [vmem:[%s2017_s15 + $0xa8] sm:$0xff]  ;;  %269 = vst [vmem:[%s234_s16 + $0x48] sm:$0xff] %v268_v9 }
  0x1a   : > { %271 = vst [vmem:[%s234_s16 + $0x50] sm:$0xff] %v270_v10  ;;  %273 = vst [vmem:[%s234_s16 + $0x58] sm:$0xff] %v272_v11  ;;  %v274_v12 = vld [vmem:[%s2017_s15 + $0xc0] sm:$0xff]  ;;  %v276_v13 = vld [vmem:[%s2017_s15 + $0xc8] sm:$0xff] }
  0x1b   : > { %v278_v14 = vld [vmem:[%s2017_s15 + $0xe0] sm:$0xff]  ;;  %275 = vst [vmem:[%s234_s16 + $0x60] sm:$0xff] %v274_v12  ;;  %277 = vst [vmem:[%s234_s16 + $0x68] sm:$0xff] %v276_v13  ;;  %v280_v15 = vld [vmem:[%s2017_s15 + $0xe8] sm:$0xff] }
  0x1c   : > { %279 = vst [vmem:[%s234_s16 + $0x70] sm:$0xff] %v278_v14  ;;  %281 = vst [vmem:[%s234_s16 + $0x78] sm:$0xff] %v280_v15 }
  0x1d PF: > { %p1696_p7 = scmp.ge.s32.totalorder %s1933_s26, 1  ;;  %p286_p8 = scmp.lt.s32.totalorder %s1933_s26, 3 }
  0x1f   : > { %p287_p9 = pnand %p1696_p7, %p286_p8 }
  0x20   : > { %s293_s17 = sand.u32 (!%p287_p9), 1, %s1925_s24   ;;  %v1935_v16 = vmov (!%p287_p9), 0.0   ;;  %v1936_v17 = vmov (!%p287_p9), 0   ;;  %v370_v18 = vld [vmem:[%s2609_s2] sm:$0xff] (!%p287_p9)  ;;  %v371_v36 = vld [vmem:[%s2609_s2 + $0x8] sm:$0xff] (!%p287_p9)  ;;  %v372_v39 = vld [vmem:[%s2609_s2 + $0x10] sm:$0xff] (!%p287_p9) }
  0x21   : > { %290 = sbr.rel (%p287_p9) target bundleno = 938 (0x3aa), region = 67  ;;  %s1697_s18 = sshll.u32 (!%p287_p9), %s293_s17, 7  ;;  %696 = vmatprep.mubr.f32.mxu0 (!%p287_p9), %v1935_v16  ;;  %1909 = vset.pattern.permute.xlu0 (!%p287_p9), %v1936_v17  ;;  %v374_v40 = vld [vmem:[%s2609_s2 + $0x20] sm:$0xff] (!%p287_p9)  ;;  %v373_v42 = vld [vmem:[%s2609_s2 + $0x18] sm:$0xff] (!%p287_p9)  ;;  %v376_v46 = vld [vmem:[%s2609_s2 + $0x30] sm:$0xff] (!%p287_p9)  ;;  %vm544_vm0 = vcmask (!%p287_p9), 523264  }
  0x22   : > { %1910 = vset.pattern.permute.xlu1 (!%p287_p9), %v1936_v17  ;;  %s2044_s21 = scalar_lea.vmem (!%p287_p9), [#allocation2], %s1697_s18  ;;  %401 = vperm.xlu0 (!%p287_p9), %1909, %v370_v18   ;;  %v375_v48 = vld [vmem:[%s2609_s2 + $0x28] sm:$0xff] (!%p287_p9)  ;;  %v378_v49 = vld [vmem:[%s2609_s2 + $0x40] sm:$0xff] (!%p287_p9)  ;;  %v377_v51 = vld [vmem:[%s2609_s2 + $0x38] sm:$0xff] (!%p287_p9)  ;;  %vm1121_vm1 = vcmask (!%p287_p9), 850944   ;;  %s1698_s19 = sshll.u32 (!%p287_p9), %s293_s17, 6 }
  0x23   : > { %v355_v19 = vld [vmem:[%s2044_s21 + $0x8] sm:$0xff] (!%p287_p9)  ;;  %v357_v20 = vld [vmem:[%s2044_s21 + $0x18] sm:$0xff] (!%p287_p9)  ;;  %v354_v21 = vld [vmem:[%s2044_s21] sm:$0xff] (!%p287_p9)  ;;  %411 = vperm.xlu1 (!%p287_p9), %1910, %v372_v39   ;;  %s2572_s20 = scalar_lea.vmem (!%p287_p9), [#allocation3], %s1698_s19 }
  0x24   : > { %v1763_v22 = vpack.c.bf16 (!%p287_p9), %v357_v20, %v355_v19  ;;  %v356_v23 = vld [vmem:[%s2044_s21 + $0x10] sm:$0xff] (!%p287_p9)  ;;  %v359_v24 = vld [vmem:[%s2044_s21 + $0x28] sm:$0xff] (!%p287_p9)  ;;  %v361_v25 = vld [vmem:[%s2044_s21 + $0x38] sm:$0xff] (!%p287_p9) }
  0x25   : > { %v1765_v26 = vpack.c.bf16 (!%p287_p9), %v356_v23, %v354_v21  ;;  %v1767_v27 = vpack.c.bf16 (!%p287_p9), %v361_v25, %v359_v24  ;;  %v358_v28 = vld [vmem:[%s2044_s21 + $0x20] sm:$0xff] (!%p287_p9)  ;;  %v360_v29 = vld [vmem:[%s2044_s21 + $0x30] sm:$0xff] (!%p287_p9)  ;;  %v363_v30 = vld [vmem:[%s2044_s21 + $0x48] sm:$0xff] (!%p287_p9) }
  0x26   : > { %1764 = vmatprep.subr.bf16.mxu0 (!%p287_p9), %v1763_v22  ;;  %v365_v31 = vld [vmem:[%s2044_s21 + $0x58] sm:$0xff] (!%p287_p9)  ;;  %v1769_v32 = vpack.c.bf16 (!%p287_p9), %v360_v29, %v358_v28  ;;  %v362_v34 = vld [vmem:[%s2044_s21 + $0x40] sm:$0xff] (!%p287_p9)  ;;  %v364_v35 = vld [vmem:[%s2044_s21 + $0x50] sm:$0xff] (!%p287_p9)  ;;  %406 = vperm.xlu0 (!%p287_p9), %1909, %v371_v36  }
  0x27   : > { %1766 = vmatpush1.bf16.msra.mxu0 (!%p287_p9), %v1765_v26  ;;  %v1771_v33 = vpack.c.bf16 (!%p287_p9), %v365_v31, %v363_v30  ;;  %v367_v37 = vld [vmem:[%s2044_s21 + $0x68] sm:$0xff] (!%p287_p9)  ;;  %v369_v38 = vld [vmem:[%s2044_s21 + $0x78] sm:$0xff] (!%p287_p9)  ;;  %v1773_v41 = vpack.c.bf16 (!%p287_p9), %v364_v35, %v362_v34  ;;  %v366_v44 = vld [vmem:[%s2044_s21 + $0x60] sm:$0xff] (!%p287_p9)  ;;  %416 = vperm.xlu1 (!%p287_p9), %1910, %v373_v42  }
  0x28   : > { %1768 = vmatprep.subr.bf16.mxu0 %v1767_v27  ;;  %v1775_v43 = vpack.c.bf16 %v369_v38, %v367_v37  ;;  %v368_v45 = vld [vmem:[%s2044_s21 + $0x70] sm:$0xff]  ;;  %v325_v50 = vld [vmem:[%s2608_s1] sm:$0xff]  ;;  %v326_v53 = vld [vmem:[%s2608_s1 + $0x8] sm:$0xff]  ;;  %s1762_s24 = sshll.u32 (%p2007_p5), %s1689_s27, 4 }
  0x29   : > { %v1777_v47 = vpack.c.bf16 %v368_v45, %v366_v44  ;;  %v380_v52 = vld [vmem:[%s2609_s2 + $0x50] sm:$0xff]  ;;  %v379_v54 = vld [vmem:[%s2609_s2 + $0x48] sm:$0xff]  ;;  %v382_v55 = vld [vmem:[%s2609_s2 + $0x60] sm:$0xff]  ;;  %s1601_s22 = scalar_lea.vmem (%p2007_p5), %s2614_s7, %s1762_s24 }
  0x2a   : > { %421 = vperm.xlu0 %1909, %v374_v40   ;;  %v327_v56 = vld [vmem:[%s2608_s1 + $0x10] sm:$0xff]  ;;  %v381_v57 = vld [vmem:[%s2609_s2 + $0x58] sm:$0xff]  ;;  %v383_v60 = vld [vmem:[%s2609_s2 + $0x68] sm:$0xff] }
  0x2b   : > { %1770 = vmatpush1.bf16.msra.mxu0 %v1769_v32  ;;  %426 = vperm.xlu1 %1910, %v375_v48   ;;  %v384_v58 = vld [vmem:[%s2609_s2 + $0x70] sm:$0xff]  ;;  %v328_v59 = vld [vmem:[%s2608_s1 + $0x18] sm:$0xff]  ;;  %v386_v61 = vld [vmem:[%s2609_s2 + $0x80] sm:$0xff] }
  0x2c   : > { %1772 = vmatprep.subr.bf16.mxu0 %v1771_v33  ;;  %v329_v62 = vld [vmem:[%s2608_s1 + $0x20] sm:$0xff]  ;;  %v385_v63 = vld [vmem:[%s2609_s2 + $0x78] sm:$0xff]  ;;  %v388_v0 = vld [vmem:[%s2609_s2 + $0x90] sm:$0xff] }
  0x2d   : > { %v330_v1 = vld [vmem:[%s2608_s1 + $0x28] sm:$0xff]  ;;  %v390_v3 = vld [vmem:[%s2609_s2 + $0xa0] sm:$0xff]  ;;  %v331_v4 = vld [vmem:[%s2608_s1 + $0x30] sm:$0xff] }
  0x2e   : > { %431 = vperm.xlu0 %1909, %v376_v46   ;;  %v387_v2 = vld [vmem:[%s2609_s2 + $0x88] sm:$0xff]  ;;  %v389_v5 = vld [vmem:[%s2609_s2 + $0x98] sm:$0xff]  ;;  %v392_v6 = vld [vmem:[%s2609_s2 + $0xb0] sm:$0xff] }
  0x2f   : > { %1774 = vmatpush1.bf16.msra.mxu0 %v1773_v41  ;;  %436 = vperm.xlu1 %1910, %v377_v51   ;;  %v332_v7 = vld [vmem:[%s2608_s1 + $0x38] sm:$0xff]  ;;  %v391_v8 = vld [vmem:[%s2609_s2 + $0xa8] sm:$0xff]  ;;  %v394_v9 = vld [vmem:[%s2609_s2 + $0xc0] sm:$0xff] }
  0x30   : > { %1776 = vmatprep.subr.bf16.mxu0 %v1775_v43  ;;  %v333_v10 = vld [vmem:[%s2608_s1 + $0x40] sm:$0xff]  ;;  %v393_v11 = vld [vmem:[%s2609_s2 + $0xb8] sm:$0xff]  ;;  %v396_v12 = vld [vmem:[%s2609_s2 + $0xd0] sm:$0xff] }
  0x31   : > { %v334_v13 = vld [vmem:[%s2608_s1 + $0x48] sm:$0xff]  ;;  %v398_v15 = vld [vmem:[%s2609_s2 + $0xe0] sm:$0xff]  ;;  %v335_v17 = vld [vmem:[%s2608_s1 + $0x50] sm:$0xff] }
  0x32   : > { %441 = vperm.xlu0 %1909, %v378_v49   ;;  %v395_v14 = vld [vmem:[%s2609_s2 + $0xc8] sm:$0xff]  ;;  %v397_v18 = vld [vmem:[%s2609_s2 + $0xd8] sm:$0xff]  ;;  %v977_v21 = vld [vmem:[%s2611_s4] sm:$0xff] }
  0x33   : > { %1778 = vmatpush1.bf16.msra.mxu0 %v1777_v47  ;;  %446 = vperm.xlu1 %1910, %v379_v54   ;;  %v978_v19 = vld [vmem:[%s2611_s4 + $0x8] sm:$0xff]  ;;  %v336_v20 = vld [vmem:[%s2608_s1 + $0x58] sm:$0xff]  ;;  %v337_v23 = vld [vmem:[%s2608_s1 + $0x60] sm:$0xff] }
  0x34   : > { %v980_v22 = vld [vmem:[%s2611_s4 + $0x18] sm:$0xff]  ;;  %v979_v24 = vld [vmem:[%s2611_s4 + $0x10] sm:$0xff]  ;;  %v982_v25 = vld [vmem:[%s2611_s4 + $0x28] sm:$0xff] }
  0x35   : > { %v338_v26 = vld [vmem:[%s2608_s1 + $0x68] sm:$0xff]  ;;  %v981_v27 = vld [vmem:[%s2611_s4 + $0x20] sm:$0xff]  ;;  %v984_v28 = vld [vmem:[%s2611_s4 + $0x38] sm:$0xff] }
  0x36   : > { %1699 = vmatmul.mubr.msk.f32.vlgmr.msra.gmra.mrb[0].mxu0 %vm544_vm0, %v325_v50  ;;  %451 = vperm.xlu0 %1909, %v380_v52   ;;  %v339_v29 = vld [vmem:[%s2608_s1 + $0x70] sm:$0xff]  ;;  %v986_v31 = vld [vmem:[%s2611_s4 + $0x48] sm:$0xff]  ;;  %v340_v32 = vld [vmem:[%s2608_s1 + $0x78] sm:$0xff] }
  0x37   : > { %702 = vmatprep.mubr.f32.mxu0 %v1935_v16  ;;  %456 = vperm.xlu1 %1910, %v381_v57   ;;  %v983_v30 = vld [vmem:[%s2611_s4 + $0x30] sm:$0xff]  ;;  %v985_v33 = vld [vmem:[%s2611_s4 + $0x40] sm:$0xff]  ;;  %v988_v34 = vld [vmem:[%s2611_s4 + $0x58] sm:$0xff] }
  0x38   : > { %v341_v35 = vld [vmem:[%s2608_s1 + $0x80] sm:$0xff]  ;;  %v987_v36 = vld [vmem:[%s2611_s4 + $0x50] sm:$0xff]  ;;  %v990_v37 = vld [vmem:[%s2611_s4 + $0x68] sm:$0xff] }
  0x39   : > { %v342_v38 = vld [vmem:[%s2608_s1 + $0x88] sm:$0xff]  ;;  %v989_v39 = vld [vmem:[%s2611_s4 + $0x60] sm:$0xff]  ;;  %v992_v40 = vld [vmem:[%s2611_s4 + $0x78] sm:$0xff] }
  0x3a   : > { %1700 = vmatmul.mubr.msk.f32.gmra.mrb[2].mxu0 %vm544_vm0, %v326_v53  ;;  %461 = vperm.xlu0 %1909, %v382_v55   ;;  %v343_v41 = vld [vmem:[%s2608_s1 + $0x90] sm:$0xff]  ;;  %v994_v43 = vld [vmem:[%s2611_s4 + $0x88] sm:$0xff]  ;;  %v344_v44 = vld [vmem:[%s2608_s1 + $0x98] sm:$0xff] }
  0x3b   : > { %708 = vmatprep.mubr.f32.mxu0 %v1935_v16  ;;  %466 = vperm.xlu1 %1910, %v383_v60   ;;  %v991_v42 = vld [vmem:[%s2611_s4 + $0x70] sm:$0xff]  ;;  %v993_v45 = vld [vmem:[%s2611_s4 + $0x80] sm:$0xff]  ;;  %v996_v46 = vld [vmem:[%s2611_s4 + $0x98] sm:$0xff] }
  0x3c   : > { %v345_v47 = vld [vmem:[%s2608_s1 + $0xa0] sm:$0xff]  ;;  %v995_v48 = vld [vmem:[%s2611_s4 + $0x90] sm:$0xff]  ;;  %v998_v49 = vld [vmem:[%s2611_s4 + $0xa8] sm:$0xff] }
  0x3d   : > { %v346_v50 = vld [vmem:[%s2608_s1 + $0xa8] sm:$0xff]  ;;  %v997_v51 = vld [vmem:[%s2611_s4 + $0xa0] sm:$0xff]  ;;  %v1000_v52 = vld [vmem:[%s2611_s4 + $0xb8] sm:$0xff] }
  0x3e   : > { %1701 = vmatmul.mubr.msk.f32.gmra.mrb[4].mxu0 %vm544_vm0, %v327_v56  ;;  %471 = vperm.xlu0 %1909, %v384_v58   ;;  %v347_v53 = vld [vmem:[%s2608_s1 + $0xb0] sm:$0xff]  ;;  %v1460_v55 = vld [vmem:[%s2613_s6 + $0x8] sm:$0xff]  ;;  %v348_v56 = vld [vmem:[%s2608_s1 + $0xb8] sm:$0xff] }
  0x3f   : > { %714 = vmatprep.mubr.f32.mxu0 %v1935_v16  ;;  %476 = vperm.xlu1 %1910, %v385_v63   ;;  %v999_v54 = vld [vmem:[%s2611_s4 + $0xb0] sm:$0xff]  ;;  %v1459_v57 = vld [vmem:[%s2613_s6] sm:$0xff]  ;;  %v1462_v58 = vld [vmem:[%s2613_s6 + $0x18] sm:$0xff] }
  0x40   : > { %v1461_v60 = vld [vmem:[%s2613_s6 + $0x10] sm:$0xff]  ;;  %v352_v63 = vld [vmem:[%s2608_s1 + $0xd8] sm:$0xff] }
  0x42   : > { %1702 = vmatmul.mubr.msk.f32.gmra.mrb[6].mxu0 %vm544_vm0, %v328_v59  ;;  %481 = vperm.xlu0 %1909, %v386_v61   ;;  %v349_v59 = vld [vmem:[%s2608_s1 + $0xc0] sm:$0xff]  ;;  %v350_v61 = vld [vmem:[%s2608_s1 + $0xc8] sm:$0xff] }
  0x43   : > { %720 = vmatprep.mubr.f32.mxu0 %v1935_v16  ;;  %486 = vperm.xlu1 %1910, %v387_v2  }
  0x46   : > { %1703 = vmatmul.mubr.msk.f32.gmra.mrb[8].mxu0 %vm544_vm0, %v329_v62  ;;  %491 = vperm.xlu0 %1909, %v388_v0   ;;  %v351_v62 = vld [vmem:[%s2608_s1 + $0xd0] sm:$0xff]  ;;  %v353_v0 = vld [vmem:[%s2608_s1 + $0xe0] sm:$0xff] }
  0x47   : > { %726 = vmatprep.mubr.f32.mxu0 %v1935_v16  ;;  %496 = vperm.xlu1 %1910, %v389_v5  }
  0x4a   : > { %1704 = vmatmul.mubr.msk.f32.gmra.mrb[10].mxu0 %vm544_vm0, %v330_v1  ;;  %501 = vperm.xlu0 %1909, %v390_v3   ;;  %v930_v1 = vld [vmem:[%s2610_s3 + $0x8] sm:$0xff] }
  0x4b   : > { %732 = vmatprep.mubr.f32.mxu0 %v1935_v16  ;;  %506 = vperm.xlu1 %1910, %v391_v8  }
  0x4c   : > { %1728 = vmatprep.mubr.msk.f32.mxu1 %vm1121_vm1, %v930_v1 }
  0x4e   : > { %1705 = vmatmul.mubr.msk.f32.gmra.mrb[12].mxu0 %vm544_vm0, %v331_v4  ;;  %511 = vperm.xlu0 %1909, %v392_v6  }
  0x4f   : > { %738 = vmatprep.mubr.f32.mxu0 %v1935_v16  ;;  %516 = vperm.xlu1 %1910, %v393_v11  }
  0x52   : > { %1706 = vmatmul.mubr.msk.f32.gmra.mrb[14].mxu0 %vm544_vm0, %v332_v7  ;;  %521 = vperm.xlu0 %1909, %v394_v9  }
  0x53   : > { %744 = vmatprep.mubr.f32.mxu0 %v1935_v16  ;;  %526 = vperm.xlu1 %1910, %v395_v14  }
  0x56   : > { %1707 = vmatmul.mubr.msk.f32.gmra.mrb[16].mxu0 %vm544_vm0, %v333_v10  ;;  %531 = vperm.xlu0 %1909, %v396_v12  }
  0x57   : > { %750 = vmatprep.mubr.f32.mxu0 %v1935_v16  ;;  %536 = vperm.xlu1 %1910, %v397_v18  }
  0x5a   : > { %1708 = vmatmul.mubr.msk.f32.gmra.mrb[18].mxu0 %vm544_vm0, %v334_v13  ;;  %541 = vperm.xlu0 %1909, %v398_v15  }
  0x5b   : > { %756 = vmatprep.mubr.f32.mxu0 %v1935_v16  ;;  %1003 = vperm.xlu1 %1910, %v977_v21  }
  0x5e   : > { %1709 = vmatmul.mubr.msk.f32.gmra.mrb[20].mxu0 %vm544_vm0, %v335_v17  ;;  %1008 = vperm.xlu0 %1909, %v978_v19  }
  0x5f   : > { %762 = vmatprep.mubr.f32.mxu0 %v1935_v16  ;;  %1013 = vperm.xlu1 %1910, %v979_v24  }
  0x62   : > { %1710 = vmatmul.mubr.msk.f32.gmra.mrb[22].mxu0 %vm544_vm0, %v336_v20  ;;  %1018 = vperm.xlu0 %1909, %v980_v22  }
  0x63   : > { %768 = vmatprep.mubr.f32.mxu0 %v1935_v16  ;;  %1023 = vperm.xlu1 %1910, %v981_v27  }
  0x66   : > { %1711 = vmatmul.mubr.msk.f32.gmra.mrb[24].mxu0 %vm544_vm0, %v337_v23  ;;  %1028 = vperm.xlu0 %1909, %v982_v25  }
  0x67   : > { %774 = vmatprep.mubr.f32.mxu0 %v1935_v16  ;;  %1033 = vperm.xlu1 %1910, %v983_v30  }
  0x6a   : > { %1712 = vmatmul.mubr.msk.f32.gmra.mrb[26].mxu0 %vm544_vm0, %v338_v26  ;;  %1038 = vperm.xlu0 %1909, %v984_v28  }
  0x6b   : > { %780 = vmatprep.mubr.f32.mxu0 %v1935_v16  ;;  %1043 = vperm.xlu1 %1910, %v985_v33  }
  0x6e   : > { %1713 = vmatmul.mubr.msk.f32.gmra.mrb[28].mxu0 %vm544_vm0, %v339_v29  ;;  %1048 = vperm.xlu0 %1909, %v986_v31  }
  0x6f   : > { %786 = vmatprep.mubr.f32.mxu0 %v1935_v16  ;;  %1053 = vperm.xlu1 %1910, %v987_v36  }
  0x72   : > { %1714 = vmatmul.mubr.msk.f32.gmra.mrb[30].mxu0 %vm544_vm0, %v340_v32  ;;  %1058 = vperm.xlu0 %1909, %v988_v34  }
  0x73   : > { %792 = vmatprep.mubr.f32.mxu0 %v1935_v16  ;;  %1063 = vperm.xlu1 %1910, %v989_v39  }
  0x76   : > { %1715 = vmatmul.mubr.msk.f32.gmra.mrb[32].mxu0 %vm544_vm0, %v341_v35  ;;  %1068 = vperm.xlu0 %1909, %v990_v37  }
  0x77   : > { %798 = vmatprep.mubr.f32.mxu0 %v1935_v16  ;;  %1073 = vperm.xlu1 %1910, %v991_v42  }
  0x7a   : > { %1716 = vmatmul.mubr.msk.f32.gmra.mrb[34].mxu0 %vm544_vm0, %v342_v38  ;;  %1078 = vperm.xlu0 %1909, %v992_v40  }
  0x7b   : > { %804 = vmatprep.mubr.f32.mxu0 %v1935_v16  ;;  %1083 = vperm.xlu1 %1910, %v993_v45  }
  0x7e   : > { %1717 = vmatmul.mubr.msk.f32.gmra.mrb[36].mxu0 %vm544_vm0, %v343_v41  ;;  %1088 = vperm.xlu0 %1909, %v994_v43  }
  0x7f   : > { %810 = vmatprep.mubr.f32.mxu0 %v1935_v16  ;;  %1093 = vperm.xlu1 %1910, %v995_v48  }
  0x82   : > { %1718 = vmatmul.mubr.msk.f32.gmra.mrb[38].mxu0 %vm544_vm0, %v344_v44  ;;  %1098 = vperm.xlu0 %1909, %v996_v46  }
  0x83   : > { %816 = vmatprep.mubr.f32.mxu0 %v1935_v16  ;;  %1103 = vperm.xlu1 %1910, %v997_v51  }
  0x86   : > { %1719 = vmatmul.mubr.msk.f32.gmra.mrb[40].mxu0 %vm544_vm0, %v345_v47  ;;  %1108 = vperm.xlu0 %1909, %v998_v49  }
  0x87   : > { %822 = vmatprep.mubr.f32.mxu0 %v1935_v16  ;;  %1113 = vperm.xlu1 %1910, %v999_v54  }
  0x8a   : > { %1720 = vmatmul.mubr.msk.f32.gmra.mrb[42].mxu0 %vm544_vm0, %v346_v50  ;;  %1118 = vperm.xlu0 %1909, %v1000_v52  }
  0x8b   : > { %828 = vmatprep.mubr.f32.mxu0 %v1935_v16  ;;  %1465 = vperm.xlu1 %1910, %v1459_v57  }
  0x8e   : > { %1721 = vmatmul.mubr.msk.f32.gmra.mrb[44].mxu0 %vm544_vm0, %v347_v53  ;;  %1470 = vperm.xlu0 %1909, %v1460_v55  }
  0x8f   : > { %834 = vmatprep.mubr.f32.mxu0 %v1935_v16  ;;  %1475 = vperm.xlu1 %1910, %v1461_v60  }
  0x92   : > { %1722 = vmatmul.mubr.msk.f32.gmra.mrb[46].mxu0 %vm544_vm0, %v348_v56  ;;  %1480 = vperm.xlu0 %1909, %v1462_v58  }
  0x93   : > { %840 = vmatprep.mubr.f32.mxu0 %v1935_v16 }
  0x96   : > { %1723 = vmatmul.mubr.msk.f32.gmra.mrb[48].mxu0 %vm544_vm0, %v349_v59 }
  0x97   : > { %846 = vmatprep.mubr.f32.mxu0 %v1935_v16 }
  0x9a   : > { %1724 = vmatmul.mubr.msk.f32.gmra.mrb[50].mxu0 %vm544_vm0, %v350_v61 }
  0x9b   : > { %852 = vmatprep.mubr.f32.mxu0 %v1935_v16 }
  0x9e   : > { %1725 = vmatmul.mubr.msk.f32.gmra.mrb[52].mxu0 %vm544_vm0, %v351_v62 }
  0x9f   : > { %858 = vmatprep.mubr.f32.mxu0 %v1935_v16 }
  0xa1   : > { %v402_v2 = vpop.permute.xlu0 %401 }
  0xa2   : > { %1726 = vmatmul.mubr.msk.f32.gmra.mrb[54].mxu0 %vm544_vm0, %v352_v63  ;;  %v412_v10 = vpop.permute.xlu1 %411 }
  0xa3   : > { %864 = vmatprep.mubr.f32.mxu0 %v1935_v16 }
  0xa5   : > { %v407_v6 = vpop.permute.xlu0 %406 }
  0xa6   : > { %1727 = vmatmul.mubr.msk.f32.gmra.mrb[56].mxu0 %vm544_vm0, %v353_v0  ;;  %v417_v22 = vpop.permute.xlu1 %416 }
  0xa9   : > { %v422_v35 = vpop.permute.xlu0 %421 }
  0xaa   : > { %v427_v38 = vpop.permute.xlu1 %426 }
  0xad   : > { %v432_v51 = vpop.permute.xlu0 %431 }
  0xae   : > { %v437_v54 = vpop.permute.xlu1 %436 }
 0x109   : > { %v698_v3 = vpop.f32.mrb[0].mxu0 }
 0x10a   : > { %v700_v4 = vpop.f32.mrb[1].mxu0  ;;  %v699_v5 = vadd.f32 %v698_v3, %v402_v2  ;;  %v442_v3 = vpop.permute.xlu0 %441 }
 0x10b   : > { %v701_v7 = vadd.f32 %v700_v4, %v402_v2 }
 0x10c   : > { %v871_v12 = vmax.f32 %v699_v5, 0.0 }
 0x10d   : > { %v704_v16 = vpop.f32.mrb[2].mxu0  ;;  %v872_v14 = vmax.f32 %v701_v7, 0.0 }
 0x10e   : > { %v705_v8 = vadd.f32 %v704_v16, %v407_v6  ;;  %v706_v9 = vpop.f32.mrb[3].mxu0 }
 0x10f   : > { %v707_v11 = vadd.f32 %v706_v9, %v407_v6  ;;  %v447_v6 = vpop.permute.xlu1 %446 }
 0x110   : > { %v873_v13 = vmax.f32 %v705_v8, 0.0 }
 0x111   : > { %v874_v15 = vmax.f32 %v707_v11, 0.0  ;;  %v710_v17 = vpop.f32.mrb[4].mxu0 }
 0x112   : > { %v712_v18 = vpop.f32.mrb[5].mxu0  ;;  %v1781_v19 = vpack.c.bf16 %v873_v13, %v871_v12  ;;  %v711_v21 = vadd.f32 %v710_v17, %v412_v10 }
 0x113   : > { %v1779_v20 = vpack.c.bf16 %v874_v15, %v872_v14  ;;  %v713_v23 = vadd.f32 %v712_v18, %v412_v10 }
 0x114   : > { %v875_v28 = vmax.f32 %v711_v21, 0.0 }
 0x115   : > { %v716_v24 = vpop.f32.mrb[6].mxu0  ;;  %1780 = vmatprep.subr.bf16.mxu1 %v1779_v20  ;;  %v876_v30 = vmax.f32 %v713_v23, 0.0 }
 0x116   : > { %v717_v25 = vadd.f32 %v716_v24, %v417_v22  ;;  %v718_v26 = vpop.f32.mrb[7].mxu0  ;;  %1782 = vmatpush1.bf16.msra.mxu1 %v1781_v19  ;;  %v452_v19 = vpop.permute.xlu0 %451 }
 0x117   : > { %v719_v27 = vadd.f32 %v718_v26, %v417_v22  ;;  %v457_v22 = vpop.permute.xlu1 %456 }
 0x118   : > { %v877_v29 = vmax.f32 %v717_v25, 0.0 }
 0x119   : > { %v878_v31 = vmax.f32 %v719_v27, 0.0  ;;  %v722_v32 = vpop.f32.mrb[8].mxu0 }
 0x11a   : > { %v1785_v33 = vpack.c.bf16 %v877_v29, %v875_v28  ;;  %v724_v34 = vpop.f32.mrb[9].mxu0  ;;  %v723_v37 = vadd.f32 %v722_v32, %v422_v35 }
 0x11b   : > { %v1783_v36 = vpack.c.bf16 %v878_v31, %v876_v30  ;;  %v725_v39 = vadd.f32 %v724_v34, %v422_v35  ;;  %v462_v35 = vpop.permute.xlu0 %461 }
 0x11c   : > { %v879_v44 = vmax.f32 %v723_v37, 0.0 }
 0x11d   : > { %v728_v40 = vpop.f32.mrb[10].mxu0  ;;  %1784 = vmatprep.subr.bf16.mxu1 %v1783_v36  ;;  %v880_v46 = vmax.f32 %v725_v39, 0.0 }
 0x11e   : > { %v729_v41 = vadd.f32 %v728_v40, %v427_v38  ;;  %v730_v42 = vpop.f32.mrb[11].mxu0  ;;  %1786 = vmatpush1.bf16.msra.mxu1 %v1785_v33 }
 0x11f   : > { %v731_v43 = vadd.f32 %v730_v42, %v427_v38  ;;  %v467_v38 = vpop.permute.xlu1 %466 }
 0x120   : > { %v881_v45 = vmax.f32 %v729_v41, 0.0 }
 0x121   : > { %v882_v47 = vmax.f32 %v731_v43, 0.0  ;;  %v734_v48 = vpop.f32.mrb[12].mxu0 }
 0x122   : > { %v1789_v49 = vpack.c.bf16 %v881_v45, %v879_v44  ;;  %v736_v50 = vpop.f32.mrb[13].mxu0  ;;  %v735_v53 = vadd.f32 %v734_v48, %v432_v51 }
 0x123   : > { %v1787_v52 = vpack.c.bf16 %v882_v47, %v880_v46  ;;  %v737_v55 = vadd.f32 %v736_v50, %v432_v51  ;;  %v472_v51 = vpop.permute.xlu0 %471 }
 0x124   : > { %v883_v60 = vmax.f32 %v735_v53, 0.0 }
 0x125   : > { %v740_v56 = vpop.f32.mrb[14].mxu0  ;;  %1788 = vmatprep.subr.bf16.mxu1 %v1787_v52  ;;  %v884_v62 = vmax.f32 %v737_v55, 0.0 }
 0x126   : > { %v741_v57 = vadd.f32 %v740_v56, %v437_v54  ;;  %v742_v58 = vpop.f32.mrb[15].mxu0  ;;  %1790 = vmatpush1.bf16.msra.mxu1 %v1789_v49 }
 0x127   : > { %v743_v59 = vadd.f32 %v742_v58, %v437_v54  ;;  %v477_v54 = vpop.permute.xlu1 %476 }
 0x128   : > { %v885_v61 = vmax.f32 %v741_v57, 0.0 }
 0x129   : > { %v886_v63 = vmax.f32 %v743_v59, 0.0  ;;  %v746_v0 = vpop.f32.mrb[16].mxu0 }
 0x12a   : > { %v1793_v1 = vpack.c.bf16 %v885_v61, %v883_v60  ;;  %v748_v2 = vpop.f32.mrb[17].mxu0  ;;  %v747_v5 = vadd.f32 %v746_v0, %v442_v3 }
 0x12b   : > { %v1791_v4 = vpack.c.bf16 %v886_v63, %v884_v62  ;;  %v749_v7 = vadd.f32 %v748_v2, %v442_v3  ;;  %v482_v3 = vpop.permute.xlu0 %481 }
 0x12c   : > { %v887_v11 = vmax.f32 %v747_v5, 0.0 }
 0x12d   : > { %v752_v16 = vpop.f32.mrb[18].mxu0  ;;  %1792 = vmatprep.subr.bf16.mxu1 %v1791_v4  ;;  %v888_v13 = vmax.f32 %v749_v7, 0.0 }
 0x12e   : > { %v753_v8 = vadd.f32 %v752_v16, %v447_v6  ;;  %v754_v9 = vpop.f32.mrb[19].mxu0  ;;  %1794 = vmatpush1.bf16.msra.mxu1 %v1793_v1 }
 0x12f   : > { %v755_v10 = vadd.f32 %v754_v9, %v447_v6  ;;  %v487_v6 = vpop.permute.xlu1 %486 }
 0x130   : > { %v889_v12 = vmax.f32 %v753_v8, 0.0 }
 0x131   : > { %v890_v14 = vmax.f32 %v755_v10, 0.0  ;;  %v758_v15 = vpop.f32.mrb[20].mxu0 }
 0x132   : > { %v1797_v17 = vpack.c.bf16 %v889_v12, %v887_v11  ;;  %v760_v18 = vpop.f32.mrb[21].mxu0  ;;  %v759_v21 = vadd.f32 %v758_v15, %v452_v19 }
 0x133   : > { %v1795_v20 = vpack.c.bf16 %v890_v14, %v888_v13  ;;  %v761_v23 = vadd.f32 %v760_v18, %v452_v19  ;;  %v492_v19 = vpop.permute.xlu0 %491 }
 0x134   : > { %v891_v28 = vmax.f32 %v759_v21, 0.0 }
 0x135   : > { %v764_v24 = vpop.f32.mrb[22].mxu0  ;;  %1796 = vmatprep.subr.bf16.mxu1 %v1795_v20  ;;  %v892_v30 = vmax.f32 %v761_v23, 0.0 }
 0x136   : > { %v765_v25 = vadd.f32 %v764_v24, %v457_v22  ;;  %v766_v26 = vpop.f32.mrb[23].mxu0  ;;  %1798 = vmatpush1.bf16.msra.mxu1 %v1797_v17 }
 0x137   : > { %v767_v27 = vadd.f32 %v766_v26, %v457_v22  ;;  %v497_v22 = vpop.permute.xlu1 %496 }
 0x138   : > { %v893_v29 = vmax.f32 %v765_v25, 0.0 }
 0x139   : > { %v894_v31 = vmax.f32 %v767_v27, 0.0  ;;  %v770_v32 = vpop.f32.mrb[24].mxu0 }
 0x13a   : > { %v1801_v33 = vpack.c.bf16 %v893_v29, %v891_v28  ;;  %v772_v34 = vpop.f32.mrb[25].mxu0  ;;  %v771_v37 = vadd.f32 %v770_v32, %v462_v35 }
 0x13b   : > { %v1799_v36 = vpack.c.bf16 %v894_v31, %v892_v30  ;;  %v773_v39 = vadd.f32 %v772_v34, %v462_v35  ;;  %v502_v35 = vpop.permute.xlu0 %501 }
 0x13c   : > { %v895_v44 = vmax.f32 %v771_v37, 0.0 }
 0x13d   : > { %v776_v40 = vpop.f32.mrb[26].mxu0  ;;  %1800 = vmatprep.subr.bf16.mxu1 %v1799_v36  ;;  %v896_v46 = vmax.f32 %v773_v39, 0.0 }
 0x13e   : > { %v777_v41 = vadd.f32 %v776_v40, %v467_v38  ;;  %v778_v42 = vpop.f32.mrb[27].mxu0  ;;  %1802 = vmatpush1.bf16.msra.mxu1 %v1801_v33 }
 0x13f   : > { %v779_v43 = vadd.f32 %v778_v42, %v467_v38  ;;  %v507_v38 = vpop.permute.xlu1 %506 }
 0x140   : > { %v897_v45 = vmax.f32 %v777_v41, 0.0 }
 0x141   : > { %v898_v47 = vmax.f32 %v779_v43, 0.0  ;;  %v782_v48 = vpop.f32.mrb[28].mxu0 }
 0x142   : > { %v1805_v49 = vpack.c.bf16 %v897_v45, %v895_v44  ;;  %v784_v50 = vpop.f32.mrb[29].mxu0  ;;  %v783_v53 = vadd.f32 %v782_v48, %v472_v51 }
 0x143   : > { %v1803_v52 = vpack.c.bf16 %v898_v47, %v896_v46  ;;  %v785_v55 = vadd.f32 %v784_v50, %v472_v51  ;;  %v512_v51 = vpop.permute.xlu0 %511 }
 0x144   : > { %v899_v60 = vmax.f32 %v783_v53, 0.0 }
 0x145   : > { %v788_v56 = vpop.f32.mrb[30].mxu0  ;;  %1804 = vmatprep.subr.bf16.mxu1 %v1803_v52  ;;  %v900_v62 = vmax.f32 %v785_v55, 0.0 }
 0x146   : > { %v789_v57 = vadd.f32 %v788_v56, %v477_v54  ;;  %v790_v58 = vpop.f32.mrb[31].mxu0  ;;  %1806 = vmatpush1.bf16.msra.mxu1 %v1805_v49 }
 0x147   : > { %v791_v59 = vadd.f32 %v790_v58, %v477_v54  ;;  %v517_v54 = vpop.permute.xlu1 %516 }
 0x148   : > { %v901_v61 = vmax.f32 %v789_v57, 0.0 }
 0x149   : > { %v902_v63 = vmax.f32 %v791_v59, 0.0  ;;  %v794_v0 = vpop.f32.mrb[32].mxu0 }
 0x14a   : > { %v1809_v1 = vpack.c.bf16 %v901_v61, %v899_v60  ;;  %v796_v2 = vpop.f32.mrb[33].mxu0  ;;  %v795_v5 = vadd.f32 %v794_v0, %v482_v3 }
 0x14b   : > { %v1807_v4 = vpack.c.bf16 %v902_v63, %v900_v62  ;;  %v797_v7 = vadd.f32 %v796_v2, %v482_v3  ;;  %v522_v3 = vpop.permute.xlu0 %521 }
 0x14c   : > { %v903_v11 = vmax.f32 %v795_v5, 0.0 }
 0x14d   : > { %v800_v16 = vpop.f32.mrb[34].mxu0  ;;  %1808 = vmatprep.subr.bf16.mxu1 %v1807_v4  ;;  %v904_v13 = vmax.f32 %v797_v7, 0.0 }
 0x14e   : > { %v801_v8 = vadd.f32 %v800_v16, %v487_v6  ;;  %v802_v9 = vpop.f32.mrb[35].mxu0  ;;  %1810 = vmatpush1.bf16.msra.mxu1 %v1809_v1 }
 0x14f   : > { %v803_v10 = vadd.f32 %v802_v9, %v487_v6  ;;  %v527_v6 = vpop.permute.xlu1 %526 }
 0x150   : > { %v905_v12 = vmax.f32 %v801_v8, 0.0 }
 0x151   : > { %v906_v14 = vmax.f32 %v803_v10, 0.0  ;;  %v806_v15 = vpop.f32.mrb[36].mxu0 }
 0x152   : > { %v1813_v17 = vpack.c.bf16 %v905_v12, %v903_v11  ;;  %v808_v18 = vpop.f32.mrb[37].mxu0  ;;  %v807_v21 = vadd.f32 %v806_v15, %v492_v19 }
 0x153   : > { %v1811_v20 = vpack.c.bf16 %v906_v14, %v904_v13  ;;  %v809_v23 = vadd.f32 %v808_v18, %v492_v19  ;;  %v532_v19 = vpop.permute.xlu0 %531 }
 0x154   : > { %v907_v28 = vmax.f32 %v807_v21, 0.0 }
 0x155   : > { %v812_v24 = vpop.f32.mrb[38].mxu0  ;;  %1812 = vmatprep.subr.bf16.mxu1 %v1811_v20  ;;  %v908_v30 = vmax.f32 %v809_v23, 0.0 }
 0x156   : > { %v813_v25 = vadd.f32 %v812_v24, %v497_v22  ;;  %v814_v26 = vpop.f32.mrb[39].mxu0  ;;  %1814 = vmatpush1.bf16.msra.mxu1 %v1813_v17 }
 0x157   : > { %v815_v27 = vadd.f32 %v814_v26, %v497_v22  ;;  %v537_v22 = vpop.permute.xlu1 %536 }
 0x158   : > { %v909_v29 = vmax.f32 %v813_v25, 0.0 }
 0x159   : > { %v910_v31 = vmax.f32 %v815_v27, 0.0  ;;  %v818_v32 = vpop.f32.mrb[40].mxu0 }
 0x15a   : > { %v1817_v33 = vpack.c.bf16 %v909_v29, %v907_v28  ;;  %v820_v34 = vpop.f32.mrb[41].mxu0  ;;  %v819_v37 = vadd.f32 %v818_v32, %v502_v35 }
 0x15b   : > { %v1815_v36 = vpack.c.bf16 %v910_v31, %v908_v30  ;;  %v821_v39 = vadd.f32 %v820_v34, %v502_v35 }
 0x15c   : > { %v911_v44 = vmax.f32 %v819_v37, 0.0 }
 0x15d   : > { %v824_v40 = vpop.f32.mrb[42].mxu0  ;;  %1816 = vmatprep.subr.bf16.mxu1 %v1815_v36  ;;  %v912_v46 = vmax.f32 %v821_v39, 0.0 }
 0x15e   : > { %v825_v41 = vadd.f32 %v824_v40, %v507_v38  ;;  %v826_v42 = vpop.f32.mrb[43].mxu0  ;;  %1818 = vmatpush1.bf16.msra.mxu1 %v1817_v33  ;;  %v542_v33 = vpop.permute.xlu0 %541 }
 0x15f   : > { %v827_v43 = vadd.f32 %v826_v42, %v507_v38  ;;  %v932_v42 = vld [vmem:[%s2610_s3 + $0x18] sm:$0xff] }
 0x160   : > { %v913_v45 = vmax.f32 %v825_v41, 0.0  ;;  %v929_v41 = vld [vmem:[%s2610_s3] sm:$0xff] }
 0x161   : > { %v914_v47 = vmax.f32 %v827_v43, 0.0  ;;  %v830_v48 = vpop.f32.mrb[44].mxu0  ;;  %v931_v43 = vld [vmem:[%s2610_s3 + $0x10] sm:$0xff] }
 0x162   : > { %v1821_v49 = vpack.c.bf16 %v913_v45, %v911_v44  ;;  %v832_v50 = vpop.f32.mrb[45].mxu0  ;;  %v831_v53 = vadd.f32 %v830_v48, %v512_v51  ;;  %v934_v44 = vld [vmem:[%s2610_s3 + $0x28] sm:$0xff]  ;;  %v933_v45 = vld [vmem:[%s2610_s3 + $0x20] sm:$0xff] }
 0x163   : > { %v1819_v52 = vpack.c.bf16 %v914_v47, %v912_v46  ;;  %v833_v55 = vadd.f32 %v832_v50, %v512_v51  ;;  %v936_v46 = vld [vmem:[%s2610_s3 + $0x38] sm:$0xff]  ;;  %v935_v47 = vld [vmem:[%s2610_s3 + $0x30] sm:$0xff]  ;;  %v938_v48 = vld [vmem:[%s2610_s3 + $0x48] sm:$0xff] }
 0x164   : > { %v915_v60 = vmax.f32 %v831_v53, 0.0  ;;  %v940_v50 = vld [vmem:[%s2610_s3 + $0x58] sm:$0xff]  ;;  %v939_v51 = vld [vmem:[%s2610_s3 + $0x50] sm:$0xff]  ;;  %v941_v53 = vld [vmem:[%s2610_s3 + $0x60] sm:$0xff] }
 0x165   : > { %v836_v56 = vpop.f32.mrb[46].mxu0  ;;  %1820 = vmatprep.subr.bf16.mxu1 %v1819_v52  ;;  %v916_v62 = vmax.f32 %v833_v55, 0.0  ;;  %v942_v52 = vld [vmem:[%s2610_s3 + $0x68] sm:$0xff]  ;;  %v943_v55 = vld [vmem:[%s2610_s3 + $0x70] sm:$0xff] }
 0x166   : > { %v837_v57 = vadd.f32 %v836_v56, %v517_v54  ;;  %v838_v58 = vpop.f32.mrb[47].mxu0  ;;  %1822 = vmatpush1.bf16.msra.mxu1 %v1821_v49  ;;  %v937_v49 = vld [vmem:[%s2610_s3 + $0x40] sm:$0xff]  ;;  %v946_v56 = vld [vmem:[%s2610_s3 + $0x88] sm:$0xff] }
 0x167   : > { %v839_v59 = vadd.f32 %v838_v58, %v517_v54  ;;  %v944_v54 = vld [vmem:[%s2610_s3 + $0x78] sm:$0xff] }
 0x168   : > { %v917_v61 = vmax.f32 %v837_v57, 0.0  ;;  %v945_v57 = vld [vmem:[%s2610_s3 + $0x80] sm:$0xff]  ;;  %v948_v58 = vld [vmem:[%s2610_s3 + $0x98] sm:$0xff] }
 0x169   : > { %v918_v63 = vmax.f32 %v839_v59, 0.0  ;;  %v842_v0 = vpop.f32.mrb[48].mxu0  ;;  %v947_v59 = vld [vmem:[%s2610_s3 + $0x90] sm:$0xff] }
 0x16a   : > { %v1825_v1 = vpack.c.bf16 %v917_v61, %v915_v60  ;;  %v844_v2 = vpop.f32.mrb[49].mxu0  ;;  %v843_v5 = vadd.f32 %v842_v0, %v522_v3  ;;  %v950_v60 = vld [vmem:[%s2610_s3 + $0xa8] sm:$0xff]  ;;  %v949_v61 = vld [vmem:[%s2610_s3 + $0xa0] sm:$0xff] }
 0x16b   : > { %v1823_v4 = vpack.c.bf16 %v918_v63, %v916_v62  ;;  %v845_v7 = vadd.f32 %v844_v2, %v522_v3  ;;  %v952_v62 = vld [vmem:[%s2610_s3 + $0xb8] sm:$0xff]  ;;  %v951_v63 = vld [vmem:[%s2610_s3 + $0xb0] sm:$0xff]  ;;  %v954_v0 = vld [vmem:[%s2610_s3 + $0xc8] sm:$0xff] }
 0x16c   : > { %v919_v11 = vmax.f32 %v843_v5, 0.0  ;;  %v956_v2 = vld [vmem:[%s2610_s3 + $0xd8] sm:$0xff]  ;;  %v955_v3 = vld [vmem:[%s2610_s3 + $0xd0] sm:$0xff]  ;;  %v957_v5 = vld [vmem:[%s2610_s3 + $0xe0] sm:$0xff] }
 0x16d   : > { %v848_v16 = vpop.f32.mrb[50].mxu0  ;;  %1824 = vmatprep.subr.bf16.mxu1 %v1823_v4  ;;  %v920_v13 = vmax.f32 %v845_v7, 0.0  ;;  %v958_v4 = vld [vmem:[%s2610_s3 + $0xe8] sm:$0xff]  ;;  %v959_v7 = vld [vmem:[%s2610_s3 + $0xf0] sm:$0xff] }
 0x16e   : > { %v849_v8 = vadd.f32 %v848_v16, %v527_v6  ;;  %v850_v9 = vpop.f32.mrb[51].mxu0  ;;  %1826 = vmatpush1.bf16.msra.mxu1 %v1825_v1  ;;  %v953_v1 = vld [vmem:[%s2610_s3 + $0xc0] sm:$0xff]  ;;  %v962_v16 = vld [vmem:[%s2610_s3 + $0x108] sm:$0xff] }
 0x16f   : > { %v851_v10 = vadd.f32 %v850_v9, %v527_v6  ;;  %v960_v6 = vld [vmem:[%s2610_s3 + $0xf8] sm:$0xff] }
 0x170   : > { %v921_v12 = vmax.f32 %v849_v8, 0.0  ;;  %v961_v8 = vld [vmem:[%s2610_s3 + $0x100] sm:$0xff]  ;;  %v964_v9 = vld [vmem:[%s2610_s3 + $0x118] sm:$0xff] }
 0x171   : > { %v922_v14 = vmax.f32 %v851_v10, 0.0  ;;  %v854_v15 = vpop.f32.mrb[52].mxu0  ;;  %v963_v10 = vld [vmem:[%s2610_s3 + $0x110] sm:$0xff] }
 0x172   : > { %v1829_v17 = vpack.c.bf16 %v921_v12, %v919_v11  ;;  %v856_v18 = vpop.f32.mrb[53].mxu0  ;;  %v855_v21 = vadd.f32 %v854_v15, %v532_v19  ;;  %v966_v11 = vld [vmem:[%s2610_s3 + $0x128] sm:$0xff]  ;;  %v965_v12 = vld [vmem:[%s2610_s3 + $0x120] sm:$0xff] }
 0x173   : > { %v1827_v20 = vpack.c.bf16 %v922_v14, %v920_v13  ;;  %v857_v23 = vadd.f32 %v856_v18, %v532_v19  ;;  %v968_v13 = vld [vmem:[%s2610_s3 + $0x138] sm:$0xff]  ;;  %v967_v14 = vld [vmem:[%s2610_s3 + $0x130] sm:$0xff]  ;;  %v970_v15 = vld [vmem:[%s2610_s3 + $0x148] sm:$0xff] }
 0x174   : > { %v923_v28 = vmax.f32 %v855_v21, 0.0  ;;  %v972_v18 = vld [vmem:[%s2610_s3 + $0x158] sm:$0xff]  ;;  %v971_v19 = vld [vmem:[%s2610_s3 + $0x150] sm:$0xff]  ;;  %v973_v21 = vld [vmem:[%s2610_s3 + $0x160] sm:$0xff] }
 0x175   : > { %v860_v24 = vpop.f32.mrb[54].mxu0  ;;  %1828 = vmatprep.subr.bf16.mxu1 %v1827_v20  ;;  %v924_v30 = vmax.f32 %v857_v23, 0.0  ;;  %v974_v20 = vld [vmem:[%s2610_s3 + $0x168] sm:$0xff]  ;;  %v975_v23 = vld [vmem:[%s2610_s3 + $0x170] sm:$0xff] }
 0x176   : > { %v861_v25 = vadd.f32 %v860_v24, %v537_v22  ;;  %v862_v26 = vpop.f32.mrb[55].mxu0  ;;  %1830 = vmatpush1.bf16.msra.mxu1 %v1829_v17  ;;  %v969_v17 = vld [vmem:[%s2610_s3 + $0x140] sm:$0xff]  ;;  %v1452_v24 = vld [vmem:[%s2612_s5 + $0x8] sm:$0xff] }
 0x177   : > { %v863_v27 = vadd.f32 %v862_v26, %v537_v22  ;;  %v976_v22 = vld [vmem:[%s2610_s3 + $0x178] sm:$0xff]  ;;  %1752 = vmatprep.mubr.msk.f32.mxu0 %vm544_vm0, %v1452_v24 }
 0x178   : > { %v925_v29 = vmax.f32 %v861_v25, 0.0 }
 0x179   : > { %v926_v31 = vmax.f32 %v863_v27, 0.0  ;;  %v866_v32 = vpop.f32.mrb[56].mxu0  ;;  %v1004_v27 = vpop.permute.xlu1 %1003 }
 0x17a   : > { %v1833_v34 = vpack.c.bf16 %v925_v29, %v923_v28  ;;  %v868_v35 = vpop.f32.mrb[57].mxu0  ;;  %v867_v38 = vadd.f32 %v866_v32, %v542_v33  ;;  %v1009_v29 = vpop.permute.xlu0 %1008 }
 0x17b   : > { %v1831_v36 = vpack.c.bf16 %v926_v31, %v924_v30  ;;  %v869_v37 = vadd.f32 %v868_v35, %v542_v33 }
 0x17c   : > { %v927_v40 = vmax.f32 %v867_v38, 0.0 }
 0x17d   : > { %v928_v39 = vmax.f32 %v869_v37, 0.0  ;;  %1832 = vmatprep.subr.bf16.mxu1 %v1831_v36 }
 0x17e   : > { %1834 = vmatpush1.bf16.msra.mxu1 %v1833_v34 }
 0x17f   : > { %1250 = vmatprep.subr.mxu1 %v928_v39 }
 0x182   : > { %1251 = vmatpush1.msra.mxu1 %v927_v40 }
 0x183   : > { %1259 = vmatmul.mubr.f32.vlgmr.msra.gmra.mrb[0].mxu1 %v929_v41 }
 0x184   : > { %1729 = vmatprep.mubr.msk.f32.mxu1 %vm1121_vm1, %v932_v42  ;;  %v1014_v42 = vpop.permute.xlu1 %1013 }
 0x187   : > { %1265 = vmatmul.mubr.f32.gmra.mrb[2].mxu1 %v931_v43 }
 0x188   : > { %1730 = vmatprep.mubr.msk.f32.mxu1 %vm1121_vm1, %v934_v44 }
 0x18b   : > { %1271 = vmatmul.mubr.f32.gmra.mrb[4].mxu1 %v933_v45  ;;  %v1019_v45 = vpop.permute.xlu0 %1018 }
 0x18c   : > { %1731 = vmatprep.mubr.msk.f32.mxu1 %vm1121_vm1, %v936_v46 }
 0x18f   : > { %1277 = vmatmul.mubr.f32.gmra.mrb[6].mxu1 %v935_v47 }
 0x190   : > { %1732 = vmatprep.mubr.msk.f32.mxu1 %vm1121_vm1, %v938_v48 }
 0x193   : > { %1283 = vmatmul.mubr.f32.gmra.mrb[8].mxu1 %v937_v49 }
 0x194   : > { %1733 = vmatprep.mubr.msk.f32.mxu1 %vm1121_vm1, %v940_v50 }
 0x197   : > { %1289 = vmatmul.mubr.f32.gmra.mrb[10].mxu1 %v939_v51 }
 0x198   : > { %1734 = vmatprep.mubr.msk.f32.mxu1 %vm1121_vm1, %v942_v52 }
 0x19b   : > { %1295 = vmatmul.mubr.f32.gmra.mrb[12].mxu1 %v941_v53 }
 0x19c   : > { %1735 = vmatprep.mubr.msk.f32.mxu1 %vm1121_vm1, %v944_v54 }
 0x19f   : > { %1301 = vmatmul.mubr.f32.gmra.mrb[14].mxu1 %v943_v55 }
 0x1a0   : > { %1736 = vmatprep.mubr.msk.f32.mxu1 %vm1121_vm1, %v946_v56 }
 0x1a3   : > { %1307 = vmatmul.mubr.f32.gmra.mrb[16].mxu1 %v945_v57 }
 0x1a4   : > { %1737 = vmatprep.mubr.msk.f32.mxu1 %vm1121_vm1, %v948_v58  ;;  %v1024_v58 = vpop.permute.xlu1 %1023 }
 0x1a7   : > { %1313 = vmatmul.mubr.f32.gmra.mrb[18].mxu1 %v947_v59 }
 0x1a8   : > { %1738 = vmatprep.mubr.msk.f32.mxu1 %vm1121_vm1, %v950_v60 }
 0x1ab   : > { %1319 = vmatmul.mubr.f32.gmra.mrb[20].mxu1 %v949_v61  ;;  %v1029_v61 = vpop.permute.xlu0 %1028 }
 0x1ac   : > { %1739 = vmatprep.mubr.msk.f32.mxu1 %vm1121_vm1, %v952_v62 }
 0x1af   : > { %1325 = vmatmul.mubr.f32.gmra.mrb[22].mxu1 %v951_v63 }
 0x1b0   : > { %1740 = vmatprep.mubr.msk.f32.mxu1 %vm1121_vm1, %v954_v0 }
 0x1b3   : > { %1331 = vmatmul.mubr.f32.gmra.mrb[24].mxu1 %v953_v1 }
 0x1b4   : > { %1741 = vmatprep.mubr.msk.f32.mxu1 %vm1121_vm1, %v956_v2 }
 0x1b7   : > { %1337 = vmatmul.mubr.f32.gmra.mrb[26].mxu1 %v955_v3 }
 0x1b8   : > { %1742 = vmatprep.mubr.msk.f32.mxu1 %vm1121_vm1, %v958_v4 }
 0x1bb   : > { %1343 = vmatmul.mubr.f32.gmra.mrb[28].mxu1 %v957_v5 }
 0x1bc   : > { %1743 = vmatprep.mubr.msk.f32.mxu1 %vm1121_vm1, %v960_v6 }
 0x1bf   : > { %1349 = vmatmul.mubr.f32.gmra.mrb[30].mxu1 %v959_v7 }
 0x1c0   : > { %1744 = vmatprep.mubr.msk.f32.mxu1 %vm1121_vm1, %v962_v16 }
 0x1c3   : > { %1355 = vmatmul.mubr.f32.gmra.mrb[32].mxu1 %v961_v8 }
 0x1c4   : > { %1745 = vmatprep.mubr.msk.f32.mxu1 %vm1121_vm1, %v964_v9  ;;  %v1034_v9 = vpop.permute.xlu1 %1033 }
 0x1c7   : > { %1361 = vmatmul.mubr.f32.gmra.mrb[34].mxu1 %v963_v10 }
 0x1c8   : > { %1746 = vmatprep.mubr.msk.f32.mxu1 %vm1121_vm1, %v966_v11 }
 0x1cb   : > { %1367 = vmatmul.mubr.f32.gmra.mrb[36].mxu1 %v965_v12  ;;  %v1039_v12 = vpop.permute.xlu0 %1038 }
 0x1cc   : > { %1747 = vmatprep.mubr.msk.f32.mxu1 %vm1121_vm1, %v968_v13 }
 0x1cf   : > { %1373 = vmatmul.mubr.f32.gmra.mrb[38].mxu1 %v967_v14 }
 0x1d0   : > { %1748 = vmatprep.mubr.msk.f32.mxu1 %vm1121_vm1, %v970_v15 }
 0x1d3   : > { %1379 = vmatmul.mubr.f32.gmra.mrb[40].mxu1 %v969_v17 }
 0x1d4   : > { %1749 = vmatprep.mubr.msk.f32.mxu1 %vm1121_vm1, %v972_v18 }
 0x1d7   : > { %1385 = vmatmul.mubr.f32.gmra.mrb[42].mxu1 %v971_v19 }
 0x1d8   : > { %1750 = vmatprep.mubr.msk.f32.mxu1 %vm1121_vm1, %v974_v20 }
 0x1db   : > { %1391 = vmatmul.mubr.f32.gmra.mrb[44].mxu1 %v973_v21 }
 0x1dc   : > { %1751 = vmatprep.mubr.msk.f32.mxu1 %vm1121_vm1, %v976_v22 }
 0x1df   : > { %1397 = vmatmul.mubr.f32.gmra.mrb[46].mxu1 %v975_v23 }
 0x256   : > { %v1260_v25 = vpop.f32.mrb[0].mxu1 }
 0x257   : > { %v1262_v26 = vpop.f32.mrb[1].mxu1  ;;  %v1261_v28 = vadd.f32 %v1260_v25, %v1004_v27 }
 0x258   : > { %v1263_v30 = vadd.f32 %v1262_v26, %v1004_v27  ;;  %v1044_v26 = vpop.permute.xlu1 %1043 }
 0x259   : > { %v1403_v35 = vmax.f32 %v1261_v28, 0.0 }
 0x25a   : > { %v1266_v31 = vpop.f32.mrb[2].mxu1  ;;  %v1404_v37 = vmax.f32 %v1263_v30, 0.0 }
 0x25b   : > { %v1267_v32 = vadd.f32 %v1266_v31, %v1009_v29  ;;  %v1268_v33 = vpop.f32.mrb[3].mxu1 }
 0x25c   : > { %v1269_v34 = vadd.f32 %v1268_v33, %v1009_v29  ;;  %v1049_v29 = vpop.permute.xlu0 %1048 }
 0x25d   : > { %v1405_v36 = vmax.f32 %v1267_v32, 0.0 }
 0x25e   : > { %v1406_v38 = vmax.f32 %v1269_v34, 0.0  ;;  %v1272_v39 = vpop.f32.mrb[4].mxu1 }
 0x25f   : > { %v1837_v40 = vpack.c.bf16 %v1405_v36, %v1403_v35  ;;  %v1274_v41 = vpop.f32.mrb[5].mxu1  ;;  %v1273_v44 = vadd.f32 %v1272_v39, %v1014_v42 }
 0x260   : > { %v1835_v43 = vpack.c.bf16 %v1406_v38, %v1404_v37  ;;  %v1275_v46 = vadd.f32 %v1274_v41, %v1014_v42  ;;  %v1054_v42 = vpop.permute.xlu1 %1053 }
 0x261   : > { %v1407_v51 = vmax.f32 %v1273_v44, 0.0 }
 0x262   : > { %v1278_v47 = vpop.f32.mrb[6].mxu1  ;;  %1836 = vmatprep.subr.bf16.mxu0 %v1835_v43  ;;  %v1408_v53 = vmax.f32 %v1275_v46, 0.0 }
 0x263   : > { %v1279_v48 = vadd.f32 %v1278_v47, %v1019_v45  ;;  %v1280_v49 = vpop.f32.mrb[7].mxu1  ;;  %1838 = vmatpush1.bf16.msra.mxu0 %v1837_v40 }
 0x264   : > { %v1281_v50 = vadd.f32 %v1280_v49, %v1019_v45  ;;  %v1059_v45 = vpop.permute.xlu0 %1058 }
 0x265   : > { %v1409_v52 = vmax.f32 %v1279_v48, 0.0 }
 0x266   : > { %v1410_v54 = vmax.f32 %v1281_v50, 0.0  ;;  %v1284_v55 = vpop.f32.mrb[8].mxu1 }
 0x267   : > { %v1841_v56 = vpack.c.bf16 %v1409_v52, %v1407_v51  ;;  %v1286_v57 = vpop.f32.mrb[9].mxu1  ;;  %v1285_v60 = vadd.f32 %v1284_v55, %v1024_v58 }
 0x268   : > { %v1839_v59 = vpack.c.bf16 %v1410_v54, %v1408_v53  ;;  %v1287_v62 = vadd.f32 %v1286_v57, %v1024_v58  ;;  %v1064_v58 = vpop.permute.xlu1 %1063 }
 0x269   : > { %v1411_v3 = vmax.f32 %v1285_v60, 0.0 }
 0x26a   : > { %v1290_v63 = vpop.f32.mrb[10].mxu1  ;;  %1840 = vmatprep.subr.bf16.mxu0 %v1839_v59  ;;  %v1412_v5 = vmax.f32 %v1287_v62, 0.0 }
 0x26b   : > { %v1291_v0 = vadd.f32 %v1290_v63, %v1029_v61  ;;  %v1292_v1 = vpop.f32.mrb[11].mxu1  ;;  %1842 = vmatpush1.bf16.msra.mxu0 %v1841_v56 }
 0x26c   : > { %v1293_v2 = vadd.f32 %v1292_v1, %v1029_v61  ;;  %v1069_v61 = vpop.permute.xlu0 %1068 }
 0x26d   : > { %v1413_v4 = vmax.f32 %v1291_v0, 0.0 }
 0x26e   : > { %v1414_v6 = vmax.f32 %v1293_v2, 0.0  ;;  %v1296_v7 = vpop.f32.mrb[12].mxu1 }
 0x26f   : > { %v1845_v16 = vpack.c.bf16 %v1413_v4, %v1411_v3  ;;  %v1298_v8 = vpop.f32.mrb[13].mxu1  ;;  %v1297_v11 = vadd.f32 %v1296_v7, %v1034_v9 }
 0x270   : > { %v1843_v10 = vpack.c.bf16 %v1414_v6, %v1412_v5  ;;  %v1299_v13 = vadd.f32 %v1298_v8, %v1034_v9  ;;  %v1074_v9 = vpop.permute.xlu1 %1073 }
 0x271   : > { %v1415_v19 = vmax.f32 %v1297_v11, 0.0 }
 0x272   : > { %v1302_v14 = vpop.f32.mrb[14].mxu1  ;;  %1844 = vmatprep.subr.bf16.mxu0 %v1843_v10  ;;  %v1416_v21 = vmax.f32 %v1299_v13, 0.0 }
 0x273   : > { %v1303_v15 = vadd.f32 %v1302_v14, %v1039_v12  ;;  %v1304_v17 = vpop.f32.mrb[15].mxu1  ;;  %1846 = vmatpush1.bf16.msra.mxu0 %v1845_v16 }
 0x274   : > { %v1305_v18 = vadd.f32 %v1304_v17, %v1039_v12  ;;  %v1079_v12 = vpop.permute.xlu0 %1078 }
 0x275   : > { %v1417_v20 = vmax.f32 %v1303_v15, 0.0 }
 0x276   : > { %v1418_v22 = vmax.f32 %v1305_v18, 0.0  ;;  %v1308_v23 = vpop.f32.mrb[16].mxu1 }
 0x277   : > { %v1849_v24 = vpack.c.bf16 %v1417_v20, %v1415_v19  ;;  %v1310_v25 = vpop.f32.mrb[17].mxu1  ;;  %v1309_v28 = vadd.f32 %v1308_v23, %v1044_v26 }
 0x278   : > { %v1847_v27 = vpack.c.bf16 %v1418_v22, %v1416_v21  ;;  %v1311_v30 = vadd.f32 %v1310_v25, %v1044_v26  ;;  %v1084_v26 = vpop.permute.xlu1 %1083 }
 0x279   : > { %v1419_v35 = vmax.f32 %v1309_v28, 0.0 }
 0x27a   : > { %v1314_v31 = vpop.f32.mrb[18].mxu1  ;;  %1848 = vmatprep.subr.bf16.mxu0 %v1847_v27  ;;  %v1420_v37 = vmax.f32 %v1311_v30, 0.0 }
 0x27b   : > { %v1315_v32 = vadd.f32 %v1314_v31, %v1049_v29  ;;  %v1316_v33 = vpop.f32.mrb[19].mxu1  ;;  %1850 = vmatpush1.bf16.msra.mxu0 %v1849_v24 }
 0x27c   : > { %v1317_v34 = vadd.f32 %v1316_v33, %v1049_v29  ;;  %v1089_v29 = vpop.permute.xlu0 %1088 }
 0x27d   : > { %v1421_v36 = vmax.f32 %v1315_v32, 0.0 }
 0x27e   : > { %v1422_v38 = vmax.f32 %v1317_v34, 0.0  ;;  %v1320_v39 = vpop.f32.mrb[20].mxu1 }
 0x27f   : > { %v1853_v40 = vpack.c.bf16 %v1421_v36, %v1419_v35  ;;  %v1322_v41 = vpop.f32.mrb[21].mxu1  ;;  %v1321_v44 = vadd.f32 %v1320_v39, %v1054_v42 }
 0x280   : > { %v1851_v43 = vpack.c.bf16 %v1422_v38, %v1420_v37  ;;  %v1323_v46 = vadd.f32 %v1322_v41, %v1054_v42  ;;  %v1094_v42 = vpop.permute.xlu1 %1093 }
 0x281   : > { %v1423_v51 = vmax.f32 %v1321_v44, 0.0 }
 0x282   : > { %v1326_v47 = vpop.f32.mrb[22].mxu1  ;;  %1852 = vmatprep.subr.bf16.mxu0 %v1851_v43  ;;  %v1424_v53 = vmax.f32 %v1323_v46, 0.0 }
 0x283   : > { %v1327_v48 = vadd.f32 %v1326_v47, %v1059_v45  ;;  %v1328_v49 = vpop.f32.mrb[23].mxu1  ;;  %1854 = vmatpush1.bf16.msra.mxu0 %v1853_v40 }
 0x284   : > { %v1329_v50 = vadd.f32 %v1328_v49, %v1059_v45  ;;  %v1099_v45 = vpop.permute.xlu0 %1098 }
 0x285   : > { %v1425_v52 = vmax.f32 %v1327_v48, 0.0 }
 0x286   : > { %v1426_v54 = vmax.f32 %v1329_v50, 0.0  ;;  %v1332_v55 = vpop.f32.mrb[24].mxu1 }
 0x287   : > { %v1857_v56 = vpack.c.bf16 %v1425_v52, %v1423_v51  ;;  %v1334_v57 = vpop.f32.mrb[25].mxu1  ;;  %v1333_v60 = vadd.f32 %v1332_v55, %v1064_v58 }
 0x288   : > { %v1855_v59 = vpack.c.bf16 %v1426_v54, %v1424_v53  ;;  %v1335_v62 = vadd.f32 %v1334_v57, %v1064_v58  ;;  %v1104_v58 = vpop.permute.xlu1 %1103 }
 0x289   : > { %v1427_v3 = vmax.f32 %v1333_v60, 0.0 }
 0x28a   : > { %v1338_v63 = vpop.f32.mrb[26].mxu1  ;;  %1856 = vmatprep.subr.bf16.mxu0 %v1855_v59  ;;  %v1428_v5 = vmax.f32 %v1335_v62, 0.0 }
 0x28b   : > { %v1339_v0 = vadd.f32 %v1338_v63, %v1069_v61  ;;  %v1340_v1 = vpop.f32.mrb[27].mxu1  ;;  %1858 = vmatpush1.bf16.msra.mxu0 %v1857_v56 }
 0x28c   : > { %v1341_v2 = vadd.f32 %v1340_v1, %v1069_v61  ;;  %v1109_v61 = vpop.permute.xlu0 %1108 }
 0x28d   : > { %v1429_v4 = vmax.f32 %v1339_v0, 0.0 }
 0x28e   : > { %v1430_v6 = vmax.f32 %v1341_v2, 0.0  ;;  %v1344_v7 = vpop.f32.mrb[28].mxu1 }
 0x28f   : > { %v1861_v16 = vpack.c.bf16 %v1429_v4, %v1427_v3  ;;  %v1346_v8 = vpop.f32.mrb[29].mxu1  ;;  %v1345_v11 = vadd.f32 %v1344_v7, %v1074_v9 }
 0x290   : > { %v1859_v10 = vpack.c.bf16 %v1430_v6, %v1428_v5  ;;  %v1347_v13 = vadd.f32 %v1346_v8, %v1074_v9  ;;  %v1114_v9 = vpop.permute.xlu1 %1113 }
 0x291   : > { %v1431_v19 = vmax.f32 %v1345_v11, 0.0 }
 0x292   : > { %v1350_v14 = vpop.f32.mrb[30].mxu1  ;;  %1860 = vmatprep.subr.bf16.mxu0 %v1859_v10  ;;  %v1432_v21 = vmax.f32 %v1347_v13, 0.0 }
 0x293   : > { %v1351_v15 = vadd.f32 %v1350_v14, %v1079_v12  ;;  %v1352_v17 = vpop.f32.mrb[31].mxu1  ;;  %1862 = vmatpush1.bf16.msra.mxu0 %v1861_v16 }
 0x294   : > { %v1353_v18 = vadd.f32 %v1352_v17, %v1079_v12  ;;  %v1119_v12 = vpop.permute.xlu0 %1118 }
 0x295   : > { %v1433_v20 = vmax.f32 %v1351_v15, 0.0 }
 0x296   : > { %v1434_v22 = vmax.f32 %v1353_v18, 0.0  ;;  %v1356_v23 = vpop.f32.mrb[32].mxu1 }
 0x297   : > { %v1865_v24 = vpack.c.bf16 %v1433_v20, %v1431_v19  ;;  %v1358_v25 = vpop.f32.mrb[33].mxu1  ;;  %v1357_v28 = vadd.f32 %v1356_v23, %v1084_v26 }
 0x298   : > { %v1863_v27 = vpack.c.bf16 %v1434_v22, %v1432_v21  ;;  %v1359_v30 = vadd.f32 %v1358_v25, %v1084_v26  ;;  %v1451_v25 = vld [vmem:[%s2612_s5] sm:$0xff]  ;;  %v1454_v26 = vld [vmem:[%s2612_s5 + $0x18] sm:$0xff] }
 0x299   : > { %v1435_v35 = vmax.f32 %v1357_v28, 0.0  ;;  %v1456_v28 = vld [vmem:[%s2612_s5 + $0x28] sm:$0xff] }
 0x29a   : > { %v1362_v31 = vpop.f32.mrb[34].mxu1  ;;  %1864 = vmatprep.subr.bf16.mxu0 %v1863_v27  ;;  %v1436_v37 = vmax.f32 %v1359_v30, 0.0  ;;  %v1453_v27 = vld [vmem:[%s2612_s5 + $0x10] sm:$0xff]  ;;  %v1458_v30 = vld [vmem:[%s2612_s5 + $0x38] sm:$0xff] }
 0x29b   : > { %v1363_v32 = vadd.f32 %v1362_v31, %v1089_v29  ;;  %v1364_v33 = vpop.f32.mrb[35].mxu1  ;;  %1866 = vmatpush1.bf16.msra.mxu0 %v1865_v24  ;;  %v1457_v31 = vld [vmem:[%s2612_s5 + $0x30] sm:$0xff] }
 0x29c   : > { %v1365_v34 = vadd.f32 %v1364_v33, %v1089_v29  ;;  %v1455_v29 = vld [vmem:[%s2612_s5 + $0x20] sm:$0xff] }
 0x29d   : > { %v1437_v36 = vmax.f32 %v1363_v32, 0.0  ;;  %v1466_v32 = vpop.permute.xlu1 %1465 }
 0x29e   : > { %v1438_v38 = vmax.f32 %v1365_v34, 0.0  ;;  %v1368_v39 = vpop.f32.mrb[36].mxu1 }
 0x29f   : > { %v1869_v40 = vpack.c.bf16 %v1437_v36, %v1435_v35  ;;  %v1370_v41 = vpop.f32.mrb[37].mxu1  ;;  %v1369_v44 = vadd.f32 %v1368_v39, %v1094_v42 }
 0x2a0   : > { %v1867_v43 = vpack.c.bf16 %v1438_v38, %v1436_v37  ;;  %v1371_v46 = vadd.f32 %v1370_v41, %v1094_v42  ;;  %v1471_v37 = vpop.permute.xlu0 %1470 }
 0x2a1   : > { %v1439_v51 = vmax.f32 %v1369_v44, 0.0  ;;  %v1476_v42 = vpop.permute.xlu1 %1475 }
 0x2a2   : > { %v1374_v47 = vpop.f32.mrb[38].mxu1  ;;  %1868 = vmatprep.subr.bf16.mxu0 %v1867_v43  ;;  %v1440_v53 = vmax.f32 %v1371_v46, 0.0 }
 0x2a3   : > { %v1375_v48 = vadd.f32 %v1374_v47, %v1099_v45  ;;  %v1376_v49 = vpop.f32.mrb[39].mxu1  ;;  %1870 = vmatpush1.bf16.msra.mxu0 %v1869_v40 }
 0x2a4   : > { %v1377_v50 = vadd.f32 %v1376_v49, %v1099_v45  ;;  %v1481_v47 = vpop.permute.xlu0 %1480 }
 0x2a5   : > { %v1441_v52 = vmax.f32 %v1375_v48, 0.0 }
 0x2a6   : > { %v1442_v54 = vmax.f32 %v1377_v50, 0.0  ;;  %v1380_v55 = vpop.f32.mrb[40].mxu1 }
 0x2a7   : > { %v1873_v56 = vpack.c.bf16 %v1441_v52, %v1439_v51  ;;  %v1382_v57 = vpop.f32.mrb[41].mxu1  ;;  %v1381_v60 = vadd.f32 %v1380_v55, %v1104_v58 }
 0x2a8   : > { %v1871_v59 = vpack.c.bf16 %v1442_v54, %v1440_v53  ;;  %v1383_v62 = vadd.f32 %v1382_v57, %v1104_v58 }
 0x2a9   : > { %v1443_v3 = vmax.f32 %v1381_v60, 0.0 }
 0x2aa   : > { %v1386_v63 = vpop.f32.mrb[42].mxu1  ;;  %1872 = vmatprep.subr.bf16.mxu0 %v1871_v59  ;;  %v1444_v5 = vmax.f32 %v1383_v62, 0.0 }
 0x2ab   : > { %v1387_v0 = vadd.f32 %v1386_v63, %v1109_v61  ;;  %v1388_v1 = vpop.f32.mrb[43].mxu1  ;;  %1874 = vmatpush1.bf16.msra.mxu0 %v1873_v56 }
 0x2ac   : > { %v1389_v2 = vadd.f32 %v1388_v1, %v1109_v61 }
 0x2ad   : > { %v1445_v4 = vmax.f32 %v1387_v0, 0.0 }
 0x2ae   : > { %v1446_v6 = vmax.f32 %v1389_v2, 0.0  ;;  %v1392_v7 = vpop.f32.mrb[44].mxu1 }
 0x2af   : > { %v1877_v16 = vpack.c.bf16 %v1445_v4, %v1443_v3  ;;  %v1394_v8 = vpop.f32.mrb[45].mxu1  ;;  %v1393_v11 = vadd.f32 %v1392_v7, %v1114_v9 }
 0x2b0   : > { %v1875_v10 = vpack.c.bf16 %v1446_v6, %v1444_v5  ;;  %v1395_v13 = vadd.f32 %v1394_v8, %v1114_v9 }
 0x2b1   : > { %v1447_v19 = vmax.f32 %v1393_v11, 0.0 }
 0x2b2   : > { %v1398_v14 = vpop.f32.mrb[46].mxu1  ;;  %1876 = vmatprep.subr.bf16.mxu0 %v1875_v10  ;;  %v1448_v21 = vmax.f32 %v1395_v13, 0.0 }
 0x2b3   : > { %v1399_v15 = vadd.f32 %v1398_v14, %v1119_v12  ;;  %v1400_v17 = vpop.f32.mrb[47].mxu1  ;;  %1878 = vmatpush1.bf16.msra.mxu0 %v1877_v16 }
 0x2b4   : > { %v1401_v18 = vadd.f32 %v1400_v17, %v1119_v12 }
 0x2b5   : > { %v1449_v20 = vmax.f32 %v1399_v15, 0.0 }
 0x2b6   : > { %v1450_v22 = vmax.f32 %v1401_v18, 0.0 }
 0x2b7   : > { %v1881_v23 = vpack.c.bf16 %v1449_v20, %v1447_v19 }
 0x2b8   : > { %v1879_v24 = vpack.c.bf16 %v1450_v22, %v1448_v21 }
 0x2ba   : > { %1880 = vmatprep.subr.bf16.mxu0 %v1879_v24 }
 0x2bb   : > { %1882 = vmatpush1.bf16.msra.mxu0 %v1881_v23 }
 0x2be   : > { %1560 = vmatmul.mubr.f32.vlgmr.msra.gmra.mrb[58].mxu0 %v1451_v25 }
 0x2bf   : > { %1753 = vmatprep.mubr.msk.f32.mxu0 %vm544_vm0, %v1454_v26 }
 0x2c2   : > { %1566 = vmatmul.mubr.f32.gmra.mrb[60].mxu0 %v1453_v27 }
 0x2c3   : > { %1754 = vmatprep.mubr.msk.f32.mxu0 %vm544_vm0, %v1456_v28 }
 0x2c6   : > { %1572 = vmatmul.mubr.f32.gmra.mrb[62].mxu0 %v1455_v29 }
 0x2c7   : > { %1755 = vmatprep.mubr.msk.f32.mxu0 %vm544_vm0, %v1458_v30 }
 0x2ca   : > { %1578 = vmatmul.mubr.f32.gmra.mrb[64].mxu0 %v1457_v31 }
 0x391   : > { %v1561_v33 = vpop.f32.mrb[58].mxu0 }
 0x392   : > { %v1562_v34 = vadd.f32 %v1561_v33, %v1466_v32  ;;  %v1563_v35 = vpop.f32.mrb[59].mxu0 }
 0x393   : > { %v1564_v36 = vadd.f32 %v1563_v35, %v1466_v32 }
 0x394   : > { %1584 = vst [vmem:[%s2572_s20] sm:$0xff] %v1562_v34 }
 0x395   : > { %1585 = vst [vmem:[%s2572_s20 + $0x8] sm:$0xff] %v1564_v36  ;;  %v1567_v38 = vpop.f32.mrb[60].mxu0 }
 0x396   : > { %v1568_v39 = vadd.f32 %v1567_v38, %v1471_v37  ;;  %v1569_v40 = vpop.f32.mrb[61].mxu0 }
 0x397   : > { %v1570_v41 = vadd.f32 %v1569_v40, %v1471_v37 }
 0x398   : > { %1586 = vst [vmem:[%s2572_s20 + $0x10] sm:$0xff] %v1568_v39 }
 0x399   : > { %1587 = vst [vmem:[%s2572_s20 + $0x18] sm:$0xff] %v1570_v41  ;;  %v1573_v43 = vpop.f32.mrb[62].mxu0 }
 0x39a   : > { %v1574_v44 = vadd.f32 %v1573_v43, %v1476_v42  ;;  %v1575_v45 = vpop.f32.mrb[63].mxu0 }
 0x39b   : > { %v1576_v46 = vadd.f32 %v1575_v45, %v1476_v42  ;;  %1598 = sbr.rel (!%p2007_p5) target bundleno = 938 (0x3aa), region = 75  ;;  %v1614_v52 = vld [vmem:[%s2572_s20] sm:$0xff] (%p2007_p5) }
 0x39c   : > { %1588 = vst [vmem:[%s2572_s20 + $0x20] sm:$0xff] %v1574_v44  ;;  %v1616_v53 = vld [vmem:[%s2572_s20 + $0x8] sm:$0xff] (%p2007_p5)  ;;  %1615 = vst [vmem:[%s1601_s22] sm:$0xff] (%p2007_p5), %v1614_v52 }
 0x39d   : > { %1589 = vst [vmem:[%s2572_s20 + $0x28] sm:$0xff] %v1576_v46  ;;  %v1579_v48 = vpop.f32.mrb[64].mxu0  ;;  %1617 = vst [vmem:[%s1601_s22 + $0x8] sm:$0xff] (%p2007_p5), %v1616_v53 }
 0x39e   : > { %v1580_v49 = vadd.f32 %v1579_v48, %v1481_v47  ;;  %v1581_v50 = vpop.f32.mrb[65].mxu0 }
 0x39f   : > { %v1582_v51 = vadd.f32 %v1581_v50, %v1481_v47  ;;  %v1618_v54 = vld [vmem:[%s2572_s20 + $0x10] sm:$0xff] (%p2007_p5) }
 0x3a0   : > { %1590 = vst [vmem:[%s2572_s20 + $0x30] sm:$0xff] %v1580_v49  ;;  %v1620_v55 = vld [vmem:[%s2572_s20 + $0x18] sm:$0xff] (%p2007_p5)  ;;  %1619 = vst [vmem:[%s1601_s22 + $0x20] sm:$0xff] (%p2007_p5), %v1618_v54 }
 0x3a1   : > { %1591 = vst [vmem:[%s2572_s20 + $0x38] sm:$0xff] %v1582_v51  ;;  %1621 = vst [vmem:[%s1601_s22 + $0x28] sm:$0xff] (%p2007_p5), %v1620_v55 }
 0x3a3   : > { %v1622_v56 = vld [vmem:[%s2572_s20 + $0x20] sm:$0xff] }
 0x3a4   : > { %v1624_v57 = vld [vmem:[%s2572_s20 + $0x28] sm:$0xff]  ;;  %1623 = vst [vmem:[%s1601_s22 + $0x40] sm:$0xff] %v1622_v56 }
 0x3a5   : > { %1625 = vst [vmem:[%s1601_s22 + $0x48] sm:$0xff] %v1624_v57 }
 0x3a7   : > { %v1626_v58 = vld [vmem:[%s2572_s20 + $0x30] sm:$0xff] }
 0x3a8   : > { %v1628_v59 = vld [vmem:[%s2572_s20 + $0x38] sm:$0xff]  ;;  %1627 = vst [vmem:[%s1601_s22 + $0x60] sm:$0xff] %v1626_v58 }
 0x3a9   : > { %1629 = vst [vmem:[%s1601_s22 + $0x68] sm:$0xff] %v1628_v59 }
 0x3aa PF: > { %p14_p10 = scmp.ge.s32.totalorder %s1994_s28, 4   ;;  %s2616_s24 = smov %s1929_s25 }
 0x3ab   : > { %s2617_s25 = smov %s2005_s8  ;;  %s2618_s26 = smov %s1994_s28 }
 0x3ac   :  { %16 = sbr.rel (!%p14_p10) target bundleno = 2 (0x2), region = 129 }

</bundles_post_ra>
